<compile_context>
chip_gen: v7x
topology: tpu7x:2x2x1
jax: 0.10.0
libtpu: 0.0.40
codegen_flags: <defaults>
</compile_context>

<pallas_src>
import functools

import jax
import jax.numpy as jnp
from jax.experimental import pallas as pl
from jax.experimental.pallas import tpu as pltpu

STATE_DIM = 16
ACTION_DIM = 8
H1 = 400
H2 = 300
MAX_ACTION = 2.0


def _round_up(x, m):
    return (x + m - 1) // m * m


def _actor_kernel(x_ref, w1_ref, b1_ref, w2_ref, b2_ref, w3_ref, b3_ref,
                  o_ref, *, max_action):
    """Fused transposed 3-layer MLP (features on sublanes, batch on lanes).

      x_ref : (S, tile)            bf16
      wN_ref: (outN_pad, inN_pad)  bf16  (transposed + zero padded)
      bN_ref: (outN_pad, 1)        f32
      o_ref : (a_sub, tile)        f32
    bf16 MXU operands, f32 accumulation; bias/ReLU/tanh in f32 (v5e-safe).
    """
    h1 = jnp.dot(w1_ref[...], x_ref[...],
                 preferred_element_type=jnp.float32) + b1_ref[...]
    h1 = jnp.maximum(h1, 0.0).astype(jnp.bfloat16)          # ReLU (f32 VPU)

    h2 = jnp.dot(w2_ref[...], h1,
                 preferred_element_type=jnp.float32) + b2_ref[...]
    h2 = jnp.maximum(h2, 0.0).astype(jnp.bfloat16)          # ReLU (f32 VPU)

    z = jnp.dot(w3_ref[...], h2,
                preferred_element_type=jnp.float32) + b3_ref[...]
    o_ref[...] = (max_action * jnp.tanh(z)).astype(o_ref.dtype)   # tanh (EUP)


def prepare_actor_params(params):
    """One-time prep: transpose, zero-pad to MXU/lane friendly dims, bf16 weights.

    Zero padding is exact: padded hidden rows get bias 0 and zero weights, so
    relu(0) = 0 feeds zero weight columns of the next layer. Accepts biases
    shaped (H,) or (1, H).
    """
    w1, b1, w2, b2, w3, b3 = params
    s_dim, h1_dim = w1.shape
    h2_dim = w2.shape[1]
    a_dim = w3.shape[1]

    h1_pad = _round_up(h1_dim, 128)      # 400 -> 512
    h2_pad = _round_up(h2_dim, 128)      # 300 -> 384 (not 512)
    a_sub = _round_up(a_dim, 16)         # 8 -> 16 output rows (bf16 sublane pack)

    def pad_w_t(w, rows, cols, r, c):
        return jnp.zeros((rows, cols), jnp.float32).at[:r, :c].set(
            w.T.astype(jnp.float32))

    def pad_b_t(b, rows, r):
        return jnp.zeros((rows, 1), jnp.float32).at[:r, 0].set(
            jnp.reshape(b, (-1,)).astype(jnp.float32))

    w1t = pad_w_t(w1, h1_pad, s_dim, h1_dim, s_dim)
    w2t = pad_w_t(w2, h2_pad, h1_pad, h2_dim, h1_dim)
    w3t = pad_w_t(w3, a_sub, h2_pad, a_dim, h2_dim)
    b1t = pad_b_t(b1, h1_pad, h1_dim)
    b2t = pad_b_t(b2, h2_pad, h2_dim)
    b3t = pad_b_t(b3, a_sub, a_dim)

    return (w1t.astype(jnp.bfloat16), b1t,
            w2t.astype(jnp.bfloat16), b2t,
            w3t.astype(jnp.bfloat16), b3t)


def _choose_tile(batch, batch_tile):
    """Batch (lane) tile: always a multiple of 128; >=2 balanced tiles when large."""
    batch_tile = max(128, _round_up(int(batch_tile), 128))
    if batch <= 128:
        return 128
    # Aim for at least two roughly balanced tiles so both v7x TensorCores get
    # work; cap at batch_tile to bound VMEM / amortize per-step overhead.
    return min(batch_tile, _round_up(pl.cdiv(batch, 2), 128))


@functools.partial(jax.jit,
                   static_argnames=("max_action", "action_dim", "batch_tile"))
def actor_forward(state, prepared_params, *, max_action, action_dim,
                  batch_tile=1024):
    """Pallas forward pass of Actor. state: (B, state_dim) f32 -> (B, action_dim)."""
    w1t, b1t, w2t, b2t, w3t, b3t = prepared_params
    h1_pad, s_dim = w1t.shape
    h2_pad = w2t.shape[0]
    a_sub = w3t.shape[0]

    batch = state.shape[0]
    assert state.shape[1] == s_dim and action_dim <= a_sub

    tile = _choose_tile(batch, batch_tile)
    n_tiles = pl.cdiv(batch, tile)
    b_pad = n_tiles * tile

    # Transposed, batch-padded bf16 input: (S, b_pad), batch on lanes.
    x_t = jnp.zeros((s_dim, b_pad), jnp.bfloat16)
    x_t = x_t.at[:, :batch].set(state.T.astype(jnp.bfloat16))

    kernel = functools.partial(_actor_kernel, max_action=float(max_action))

    def pinned(arr):
        return pl.BlockSpec(arr.shape, lambda i: (0, 0))

    weight_bytes = sum(int(p.size) * p.dtype.itemsize
                       for p in (w1t, b1t, w2t, b2t, w3t, b3t))
    flops = 2 * b_pad * (s_dim * h1_pad + h1_pad * h2_pad + h2_pad * a_sub)
    bytes_accessed = int(x_t.size * 2 + b_pad * a_sub * 4 + weight_bytes)

    # VMEM: double-buffered x/out streams + pinned weights + f32 h1/h2 live
    # ranges (with 2x headroom); floor at 16 MiB, well under v7x's 64 MiB.
    vmem_limit = int(min(100 * 2 ** 20,
                         max(16 * 2 ** 20,
                             2 * (weight_bytes + tile * (s_dim * 2 + a_sub * 4))
                             + 2 * tile * (h1_pad + h2_pad) * 4)))

    out_t = pl.pallas_call(
        kernel,
        out_shape=jax.ShapeDtypeStruct((a_sub, b_pad), jnp.float32),
        grid_spec=pltpu.PrefetchScalarGridSpec(
            num_scalar_prefetch=0,
            grid=(n_tiles,),
            in_specs=[
                pl.BlockSpec((s_dim, tile), lambda i: (0, i)),   # state tile
                pinned(w1t), pinned(b1t),                        # weights pinned
                pinned(w2t), pinned(b2t),
                pinned(w3t), pinned(b3t),
            ],
            out_specs=pl.BlockSpec((a_sub, tile), lambda i: (0, i)),
        ),
        compiler_params=pltpu.CompilerParams(
            dimension_semantics=("parallel",),
            vmem_limit_bytes=vmem_limit),
        cost_estimate=pl.CostEstimate(
            flops=flops,
            transcendentals=b_pad * a_sub,
            bytes_accessed=bytes_accessed),
    )(x_t, w1t, b1t, w2t, b2t, w3t, b3t)

    # Drop padded action rows / padded batch lanes; back to (B, action_dim).
    return out_t[:action_dim, :batch].T


def init_actor_params(key, state_dim, action_dim):
    """Deterministic init mimicking PyTorch nn.Linear default U(-1/sqrt(fan_in), +)."""
    ks = jax.random.split(key, 6)

    def linear(kw, kb, fan_in, fan_out):
        bound = 1.0 / jnp.sqrt(jnp.float32(fan_in))
        w = jax.random.uniform(kw, (fan_in, fan_out), jnp.float32, -bound, bound)
        b = jax.random.uniform(kb, (1, fan_out), jnp.float32, -bound, bound)
        return w, b

    w1, b1 = linear(ks[0], ks[1], state_dim, H1)
    w2, b2 = linear(ks[2], ks[3], H1, H2)
    w3, b3 = linear(ks[4], ks[5], H2, action_dim)
    return (w1, b1, w2, b2, w3, b3)


def actor_forward_ref(state, params, max_action):
    """Pure-JAX f32 reference for correctness check."""
    w1, b1, w2, b2, w3, b3 = params
    h1 = jnp.maximum(state @ w1 + b1, 0.0)
    h2 = jnp.maximum(h1 @ w2 + b2, 0.0)
    return max_action * jnp.tanh(h2 @ w3 + b3)


if __name__ == "__main__":
    key = jax.random.PRNGKey(0)
    k_params, k_state = jax.random.split(key)

    params = init_actor_params(k_params, STATE_DIM, ACTION_DIM)
    # One-time weight padding / transposition / bf16 cast (hoisted out of the
    # per-call path).
    prepared = jax.tree_util.tree_map(jax.block_until_ready,
                                      prepare_actor_params(params))

    state = jax.random.normal(k_state, (8, STATE_DIM), jnp.float32)
    out = jax.block_until_ready(
        actor_forward(state, prepared, max_action=MAX_ACTION,
                      action_dim=ACTION_DIM))
    ref = actor_forward_ref(state, params, MAX_ACTION)
    assert out.shape == (8, ACTION_DIM)
    # bf16 MXU operands vs f32 reference -> modest tolerance (tanh-bounded output).
    assert jnp.allclose(out, ref, atol=5e-2, rtol=5e-2), "mismatch vs JAX reference"

    # Odd batch exercises batch padding and the transposed-output slicing.
    state_odd = jax.random.normal(jax.random.PRNGKey(1), (5, STATE_DIM), jnp.float32)
    out_odd = jax.block_until_ready(
        actor_forward(state_odd, prepared, max_action=MAX_ACTION,
                      action_dim=ACTION_DIM))
    ref_odd = actor_forward_ref(state_odd, params, MAX_ACTION)
    assert out_odd.shape == (5, ACTION_DIM)
    assert jnp.allclose(out_odd, ref_odd, atol=5e-2, rtol=5e-2), "odd-batch mismatch"

    print("KERNEL_OK")
</pallas_src>

<mosaic_0001>
module attributes {stable_mosaic.version = 11 : i64} {
  func.func @_actor_kernel(%arg0: i32, %arg1: memref<16x128xbf16, #tpu.memory_space<vmem>>, %arg2: memref<512x16xbf16, #tpu.memory_space<vmem>>, %arg3: memref<512x1xf32, #tpu.memory_space<vmem>>, %arg4: memref<384x512xbf16, #tpu.memory_space<vmem>>, %arg5: memref<384x1xf32, #tpu.memory_space<vmem>>, %arg6: memref<16x384xbf16, #tpu.memory_space<vmem>>, %arg7: memref<16x1xf32, #tpu.memory_space<vmem>>, %arg8: memref<16x128xf32, #tpu.memory_space<vmem>>) attributes {dimension_semantics = [#tpu.dimension_semantics<parallel>], iteration_bounds = array<i64: 1>, scalar_prefetch = 0 : i64, scratch_operands = 0 : i64, tpu.core_type = #tpu.core_type<tc>, window_params = [{transform_indices = @transform_0, window_bounds = array<i64: 16, 128>}, {pipeline_mode = #tpu.pipeline_mode<synchronous>, transform_indices = @transform_1, window_bounds = array<i64: 512, 16>}, {pipeline_mode = #tpu.pipeline_mode<synchronous>, transform_indices = @transform_2, window_bounds = array<i64: 512, 1>}, {pipeline_mode = #tpu.pipeline_mode<synchronous>, transform_indices = @transform_3, window_bounds = array<i64: 384, 512>}, {pipeline_mode = #tpu.pipeline_mode<synchronous>, transform_indices = @transform_4, window_bounds = array<i64: 384, 1>}, {pipeline_mode = #tpu.pipeline_mode<synchronous>, transform_indices = @transform_5, window_bounds = array<i64: 16, 384>}, {pipeline_mode = #tpu.pipeline_mode<synchronous>, transform_indices = @transform_6, window_bounds = array<i64: 16, 1>}, {transform_indices = @transform_7, window_bounds = array<i64: 16, 128>}]} {
    %c0 = arith.constant 0 : index
    %c0_0 = arith.constant 0 : index
    %0 = vector.load %arg2[%c0, %c0_0] : memref<512x16xbf16, #tpu.memory_space<vmem>>, vector<512x16xbf16>
    %c0_1 = arith.constant 0 : index
    %c0_2 = arith.constant 0 : index
    %1 = vector.load %arg1[%c0_1, %c0_2] : memref<16x128xbf16, #tpu.memory_space<vmem>>, vector<16x128xbf16>
    %cst = arith.constant dense<0.000000e+00> : vector<512x128xf32>
    %2 = tpu.matmul %0, %1, %cst {dimension_numbers = #tpu.dot_dimension_numbers<[1], [0], [0], [1], [0, 0, 1, 1], [], []>} : vector<512x16xbf16>, vector<16x128xbf16>, vector<512x128xf32> -> vector<512x128xf32>
    %c0_3 = arith.constant 0 : index
    %c0_4 = arith.constant 0 : index
    %3 = vector.load %arg3[%c0_3, %c0_4] : memref<512x1xf32, #tpu.memory_space<vmem>>, vector<512x1xf32>
    %4 = vector.broadcast %3 : vector<512x1xf32> to vector<512x128xf32>
    %5 = arith.addf %2, %4 : vector<512x128xf32>
    %cst_5 = arith.constant 0.000000e+00 : f32
    %6 = vector.broadcast %cst_5 : f32 to vector<512x128xf32>
    %7 = arith.maximumf %5, %6 : vector<512x128xf32>
    %8 = arith.truncf %7 : vector<512x128xf32> to vector<512x128xbf16>
    %c0_6 = arith.constant 0 : index
    %c0_7 = arith.constant 0 : index
    %9 = vector.load %arg4[%c0_6, %c0_7] : memref<384x512xbf16, #tpu.memory_space<vmem>>, vector<384x512xbf16>
    %cst_8 = arith.constant dense<0.000000e+00> : vector<384x128xf32>
    %10 = tpu.matmul %9, %8, %cst_8 {dimension_numbers = #tpu.dot_dimension_numbers<[1], [0], [0], [1], [0, 0, 1, 1], [], []>} : vector<384x512xbf16>, vector<512x128xbf16>, vector<384x128xf32> -> vector<384x128xf32>
    %c0_9 = arith.constant 0 : index
    %c0_10 = arith.constant 0 : index
    %11 = vector.load %arg5[%c0_9, %c0_10] : memref<384x1xf32, #tpu.memory_space<vmem>>, vector<384x1xf32>
    %12 = vector.broadcast %11 : vector<384x1xf32> to vector<384x128xf32>
    %13 = arith.addf %10, %12 : vector<384x128xf32>
    %cst_11 = arith.constant 0.000000e+00 : f32
    %14 = vector.broadcast %cst_11 : f32 to vector<384x128xf32>
    %15 = arith.maximumf %13, %14 : vector<384x128xf32>
    %16 = arith.truncf %15 : vector<384x128xf32> to vector<384x128xbf16>
    %c0_12 = arith.constant 0 : index
    %c0_13 = arith.constant 0 : index
    %17 = vector.load %arg6[%c0_12, %c0_13] : memref<16x384xbf16, #tpu.memory_space<vmem>>, vector<16x384xbf16>
    %cst_14 = arith.constant dense<0.000000e+00> : vector<16x128xf32>
    %18 = tpu.matmul %17, %16, %cst_14 {dimension_numbers = #tpu.dot_dimension_numbers<[1], [0], [0], [1], [0, 0, 1, 1], [], []>} : vector<16x384xbf16>, vector<384x128xbf16>, vector<16x128xf32> -> vector<16x128xf32>
    %c0_15 = arith.constant 0 : index
    %c0_16 = arith.constant 0 : index
    %19 = vector.load %arg7[%c0_15, %c0_16] : memref<16x1xf32, #tpu.memory_space<vmem>>, vector<16x1xf32>
    %20 = vector.broadcast %19 : vector<16x1xf32> to vector<16x128xf32>
    %21 = arith.addf %18, %20 : vector<16x128xf32>
    %22 = math.tanh %21 : vector<16x128xf32>
    %cst_17 = arith.constant 2.000000e+00 : f32
    %23 = vector.broadcast %cst_17 : f32 to vector<16x128xf32>
    %24 = arith.mulf %23, %22 : vector<16x128xf32>
    %c0_18 = arith.constant 0 : index
    %c0_19 = arith.constant 0 : index
    %25 = vector.load %arg8[%c0_18, %c0_19] : memref<16x128xf32, #tpu.memory_space<vmem>>, vector<16x128xf32>
    tpu.vector_store %arg8[%c0_18, %c0_19], %24 {strides = array<i32>} : memref<16x128xf32, #tpu.memory_space<vmem>>, vector<16x128xf32>,
    return
  }
  func.func @transform_0(%arg0: i32) -> (i32, i32) {
    %c0_i32 = arith.constant 0 : i32
    %c0_i32_0 = arith.constant 0 : i32
    return %c0_i32, %arg0 : i32, i32
  }
  func.func @transform_1(%arg0: i32) -> (i32, i32) {
    %c0_i32 = arith.constant 0 : i32
    %c0_i32_0 = arith.constant 0 : i32
    %c0_i32_1 = arith.constant 0 : i32
    return %c0_i32, %c0_i32_0 : i32, i32
  }
  func.func @transform_2(%arg0: i32) -> (i32, i32) {
    %c0_i32 = arith.constant 0 : i32
    %c0_i32_0 = arith.constant 0 : i32
    %c0_i32_1 = arith.constant 0 : i32
    return %c0_i32, %c0_i32_0 : i32, i32
  }
  func.func @transform_3(%arg0: i32) -> (i32, i32) {
    %c0_i32 = arith.constant 0 : i32
    %c0_i32_0 = arith.constant 0 : i32
    %c0_i32_1 = arith.constant 0 : i32
    return %c0_i32, %c0_i32_0 : i32, i32
  }
  func.func @transform_4(%arg0: i32) -> (i32, i32) {
    %c0_i32 = arith.constant 0 : i32
    %c0_i32_0 = arith.constant 0 : i32
    %c0_i32_1 = arith.constant 0 : i32
    return %c0_i32, %c0_i32_0 : i32, i32
  }
  func.func @transform_5(%arg0: i32) -> (i32, i32) {
    %c0_i32 = arith.constant 0 : i32
    %c0_i32_0 = arith.constant 0 : i32
    %c0_i32_1 = arith.constant 0 : i32
    return %c0_i32, %c0_i32_0 : i32, i32
  }
  func.func @transform_6(%arg0: i32) -> (i32, i32) {
    %c0_i32 = arith.constant 0 : i32
    %c0_i32_0 = arith.constant 0 : i32
    %c0_i32_1 = arith.constant 0 : i32
    return %c0_i32, %c0_i32_0 : i32, i32
  }
  func.func @transform_7(%arg0: i32) -> (i32, i32) {
    %c0_i32 = arith.constant 0 : i32
    %c0_i32_0 = arith.constant 0 : i32
    return %c0_i32, %arg0 : i32, i32
  }
}

</mosaic_0001>

<bundles_post_ra>
// kernel: actor_forward.1
= control target key start
LH: loop header
LB: loop body
LE: loop exit
PB: predicated region body
PF: predicated region fallthrough
CT: control target
= control target key end

     0   :  { %v3281_v0 = vmov 0   ;;  %vm643_vm0 = vcmask 130048   ;;  %vm3283_vm1 = vmmov 0   ;;  %s4480_s2 = inlined_call_operand.vmem [shape: f32[512,1], index: 2, kind: input, shape index: {}]   ;;  %s4481_s0 = inlined_call_operand.vmem [shape: bf16[16,128], index: 0, kind: input, shape index: {}]   ;;  %s4482_s1 = inlined_call_operand.vmem [shape: bf16[512,16], index: 1, kind: input, shape index: {}]   ;;  %s4483_s4 = inlined_call_operand.vmem [shape: f32[384,1], index: 4, kind: input, shape index: {}]   ;;  %s4484_s3 = inlined_call_operand.vmem [shape: bf16[384,512], index: 3, kind: input, shape index: {}]   ;;  %s4485_s6 = inlined_call_operand.vmem [shape: f32[16,1], index: 6, kind: input, shape index: {}]   ;;  %s4486_s5 = inlined_call_operand.vmem [shape: bf16[16,384], index: 5, kind: input, shape index: {}]   ;;  %s4487_s7 = inlined_call_operand.vmem [shape: f32[16,128], index: 7, kind: output, shape index: {}]  }
   0x1   :  { %3095 = vset.pattern.permute.xlu1 %v3281_v0  ;;  %3094 = vset.pattern.permute.xlu0 %v3281_v0  ;;  %v95_v1 = vld [vmem:[%s4480_s2 + $0x10] sm:$0xff]  ;;  %v93_v2 = vld [vmem:[%s4480_s2] sm:$0xff]  ;;  %v96_v4 = vld [vmem:[%s4480_s2 + $0x18] sm:$0xff] }
   0x2   :  { %169 = vperm.xlu1 %3095, %v95_v1   ;;  %159 = vperm.xlu0 %3094, %v93_v2   ;;  %v3096_v3 = vld [vmem:[%s4481_s0] sm:$0xff]   ;;  %v94_v5 = vld [vmem:[%s4480_s2 + $0x8] sm:$0xff]  ;;  %v3099_v10 = vld [vmem:[%s4482_s1 + $0x10] sm:$0xff]  }
   0x3   :  { %1989 = vmatprep.subr.bf16.mxu1 %v3281_v0  ;;  %2863 = vmatprep.subr.bf16.mxu0 %v3096_v3  ;;  %v3097_v6 = vld [vmem:[%s4482_s1] sm:$0xff]   ;;  %v3098_v7 = vld [vmem:[%s4482_s1 + $0x8] sm:$0xff]   ;;  %v100_v11 = vld [vmem:[%s4480_s2 + $0x38] sm:$0xff] }
   0x4   :  { %2864 = vmatpush3.bf16.msra.mxu0 %v3096_v3  ;;  %v98_v8 = vld [vmem:[%s4480_s2 + $0x28] sm:$0xff]  ;;  %v97_v9 = vld [vmem:[%s4480_s2 + $0x20] sm:$0xff]  ;;  %2865 = vmatprep.mubr.msk.bf16.mxu0 %vm643_vm0, %v3097_v6  ;;  %v99_v12 = vld [vmem:[%s4480_s2 + $0x30] sm:$0xff] }
   0x5   :  { %2214 = vmatprep.subr.bf16.mxu0 %v3281_v0  ;;  %v3100_v13 = vld [vmem:[%s4482_s1 + $0x18] sm:$0xff]   ;;  %v3101_v14 = vld [vmem:[%s4482_s1 + $0x20] sm:$0xff]   ;;  %v102_v15 = vld [vmem:[%s4480_s2 + $0x48] sm:$0xff] }
   0x6   :  { %174 = vperm.xlu1 %3095, %v96_v4   ;;  %164 = vperm.xlu0 %3094, %v94_v5   ;;  %v101_v16 = vld [vmem:[%s4480_s2 + $0x40] sm:$0xff]  ;;  %v104_v17 = vld [vmem:[%s4480_s2 + $0x58] sm:$0xff]  ;;  %v103_v18 = vld [vmem:[%s4480_s2 + $0x50] sm:$0xff] }
   0x7   :  { %2866 = vmatmul.mubr.msk.bf16.vlgmr.msra.gmra.mrb[0].mxu0 %vm643_vm0, %v3098_v7  ;;  %v3102_v19 = vld [vmem:[%s4482_s1 + $0x28] sm:$0xff]   ;;  %v3103_v20 = vld [vmem:[%s4482_s1 + $0x30] sm:$0xff]   ;;  %v105_v22 = vld [vmem:[%s4480_s2 + $0x60] sm:$0xff] }
   0x8   :  { %2869 = vmatprep.mubr.msk.bf16.mxu0 %vm643_vm0, %v3099_v10  ;;  %v106_v21 = vld [vmem:[%s4480_s2 + $0x68] sm:$0xff]  ;;  %v108_v23 = vld [vmem:[%s4480_s2 + $0x78] sm:$0xff]  ;;  %v107_v24 = vld [vmem:[%s4480_s2 + $0x70] sm:$0xff] }
   0x9   :  { %v3104_v25 = vld [vmem:[%s4482_s1 + $0x38] sm:$0xff]   ;;  %v3105_v26 = vld [vmem:[%s4482_s1 + $0x40] sm:$0xff]   ;;  %v110_v27 = vld [vmem:[%s4480_s2 + $0x88] sm:$0xff] }
   0xa   :  { %184 = vperm.xlu1 %3095, %v98_v8   ;;  %179 = vperm.xlu0 %3094, %v97_v9   ;;  %v109_v28 = vld [vmem:[%s4480_s2 + $0x80] sm:$0xff]  ;;  %v112_v29 = vld [vmem:[%s4480_s2 + $0x98] sm:$0xff]  ;;  %v111_v30 = vld [vmem:[%s4480_s2 + $0x90] sm:$0xff] }
   0xb   :  { %v3106_v31 = vld [vmem:[%s4482_s1 + $0x48] sm:$0xff]   ;;  %v3107_v32 = vld [vmem:[%s4482_s1 + $0x50] sm:$0xff]   ;;  %v113_v34 = vld [vmem:[%s4480_s2 + $0xa0] sm:$0xff] }
   0xc   :  { %v114_v33 = vld [vmem:[%s4480_s2 + $0xa8] sm:$0xff]  ;;  %v116_v35 = vld [vmem:[%s4480_s2 + $0xb8] sm:$0xff]  ;;  %v115_v36 = vld [vmem:[%s4480_s2 + $0xb0] sm:$0xff] }
   0xd   :  { %v3108_v37 = vld [vmem:[%s4482_s1 + $0x58] sm:$0xff]   ;;  %v3109_v38 = vld [vmem:[%s4482_s1 + $0x60] sm:$0xff]   ;;  %v118_v39 = vld [vmem:[%s4480_s2 + $0xc8] sm:$0xff] }
   0xe   :  { %194 = vperm.xlu1 %3095, %v100_v11   ;;  %189 = vperm.xlu0 %3094, %v99_v12   ;;  %v117_v40 = vld [vmem:[%s4480_s2 + $0xc0] sm:$0xff]  ;;  %v120_v41 = vld [vmem:[%s4480_s2 + $0xd8] sm:$0xff]  ;;  %v119_v42 = vld [vmem:[%s4480_s2 + $0xd0] sm:$0xff] }
   0xf   :  { %2870 = vmatmul.mubr.msk.bf16.gmra.mrb[4].mxu0 %vm643_vm0, %v3100_v13  ;;  %v3110_v43 = vld [vmem:[%s4482_s1 + $0x68] sm:$0xff]   ;;  %v3111_v44 = vld [vmem:[%s4482_s1 + $0x70] sm:$0xff]   ;;  %v121_v46 = vld [vmem:[%s4480_s2 + $0xe0] sm:$0xff] }
  0x10   :  { %2873 = vmatprep.mubr.msk.bf16.mxu0 %vm643_vm0, %v3101_v14  ;;  %v122_v45 = vld [vmem:[%s4480_s2 + $0xe8] sm:$0xff]  ;;  %v124_v47 = vld [vmem:[%s4480_s2 + $0xf8] sm:$0xff]  ;;  %v123_v48 = vld [vmem:[%s4480_s2 + $0xf0] sm:$0xff] }
  0x11   :  { %v3112_v49 = vld [vmem:[%s4482_s1 + $0x78] sm:$0xff]   ;;  %v3113_v50 = vld [vmem:[%s4482_s1 + $0x80] sm:$0xff]   ;;  %v126_v51 = vld [vmem:[%s4480_s2 + $0x108] sm:$0xff] }
  0x12   :  { %204 = vperm.xlu1 %3095, %v102_v15   ;;  %199 = vperm.xlu0 %3094, %v101_v16   ;;  %v125_v52 = vld [vmem:[%s4480_s2 + $0x100] sm:$0xff]  ;;  %v128_v53 = vld [vmem:[%s4480_s2 + $0x118] sm:$0xff]  ;;  %v127_v54 = vld [vmem:[%s4480_s2 + $0x110] sm:$0xff] }
  0x13   :  { %v3114_v55 = vld [vmem:[%s4482_s1 + $0x88] sm:$0xff]   ;;  %v3115_v56 = vld [vmem:[%s4482_s1 + $0x90] sm:$0xff]   ;;  %v129_v58 = vld [vmem:[%s4480_s2 + $0x120] sm:$0xff] }
  0x14   :  { %v130_v57 = vld [vmem:[%s4480_s2 + $0x128] sm:$0xff]  ;;  %v132_v59 = vld [vmem:[%s4480_s2 + $0x138] sm:$0xff]  ;;  %v131_v60 = vld [vmem:[%s4480_s2 + $0x130] sm:$0xff] }
  0x15   :  { %v3116_v61 = vld [vmem:[%s4482_s1 + $0x98] sm:$0xff]   ;;  %v3117_v62 = vld [vmem:[%s4482_s1 + $0xa0] sm:$0xff]   ;;  %v134_v63 = vld [vmem:[%s4480_s2 + $0x148] sm:$0xff] }
  0x16   :  { %214 = vperm.xlu1 %3095, %v104_v17   ;;  %209 = vperm.xlu0 %3094, %v103_v18   ;;  %v133_v1 = vld [vmem:[%s4480_s2 + $0x140] sm:$0xff]  ;;  %v136_v2 = vld [vmem:[%s4480_s2 + $0x158] sm:$0xff]  ;;  %v135_v3 = vld [vmem:[%s4480_s2 + $0x150] sm:$0xff] }
  0x17   :  { %2874 = vmatmul.mubr.msk.bf16.gmra.mrb[8].mxu0 %vm643_vm0, %v3102_v19  ;;  %v3118_v4 = vld [vmem:[%s4482_s1 + $0xa8] sm:$0xff]   ;;  %v3119_v5 = vld [vmem:[%s4482_s1 + $0xb0] sm:$0xff]   ;;  %v137_v7 = vld [vmem:[%s4480_s2 + $0x160] sm:$0xff] }
  0x18   :  { %2877 = vmatprep.mubr.msk.bf16.mxu0 %vm643_vm0, %v3103_v20  ;;  %v138_v6 = vld [vmem:[%s4480_s2 + $0x168] sm:$0xff]  ;;  %v140_v8 = vld [vmem:[%s4480_s2 + $0x178] sm:$0xff]  ;;  %v139_v9 = vld [vmem:[%s4480_s2 + $0x170] sm:$0xff] }
  0x19   :  { %v3120_v10 = vld [vmem:[%s4482_s1 + $0xb8] sm:$0xff]   ;;  %v3121_v11 = vld [vmem:[%s4482_s1 + $0xc0] sm:$0xff]   ;;  %v142_v12 = vld [vmem:[%s4480_s2 + $0x188] sm:$0xff] }
  0x1a   :  { %224 = vperm.xlu1 %3095, %v106_v21   ;;  %219 = vperm.xlu0 %3094, %v105_v22   ;;  %v141_v13 = vld [vmem:[%s4480_s2 + $0x180] sm:$0xff]  ;;  %v144_v14 = vld [vmem:[%s4480_s2 + $0x198] sm:$0xff]  ;;  %v143_v15 = vld [vmem:[%s4480_s2 + $0x190] sm:$0xff] }
  0x1b   :  { %v3122_v16 = vld [vmem:[%s4482_s1 + $0xc8] sm:$0xff]   ;;  %v3123_v17 = vld [vmem:[%s4482_s1 + $0xd0] sm:$0xff]   ;;  %v145_v19 = vld [vmem:[%s4480_s2 + $0x1a0] sm:$0xff] }
  0x1c   :  { %v146_v18 = vld [vmem:[%s4480_s2 + $0x1a8] sm:$0xff]  ;;  %v148_v20 = vld [vmem:[%s4480_s2 + $0x1b8] sm:$0xff]  ;;  %v147_v21 = vld [vmem:[%s4480_s2 + $0x1b0] sm:$0xff] }
  0x1d   :  { %v3124_v22 = vld [vmem:[%s4482_s1 + $0xd8] sm:$0xff]  }
  0x1e   :  { %234 = vperm.xlu1 %3095, %v108_v23   ;;  %229 = vperm.xlu0 %3094, %v107_v24   ;;  %v3125_v23 = vld [vmem:[%s4482_s1 + $0xe0] sm:$0xff]   ;;  %v150_v24 = vld [vmem:[%s4480_s2 + $0x1c8] sm:$0xff] }
  0x1f   :  { %2878 = vmatmul.mubr.msk.bf16.gmra.mrb[12].mxu0 %vm643_vm0, %v3104_v25  ;;  %v149_v25 = vld [vmem:[%s4480_s2 + $0x1c0] sm:$0xff] }
  0x20   :  { %2881 = vmatprep.mubr.msk.bf16.mxu0 %vm643_vm0, %v3105_v26  ;;  %v152_v26 = vld [vmem:[%s4480_s2 + $0x1d8] sm:$0xff] }
  0x22   :  { %244 = vperm.xlu1 %3095, %v110_v27   ;;  %239 = vperm.xlu0 %3094, %v109_v28   ;;  %v151_v27 = vld [vmem:[%s4480_s2 + $0x1d0] sm:$0xff]  ;;  %v3126_v28 = vld [vmem:[%s4482_s1 + $0xe8] sm:$0xff]  }
  0x26   :  { %254 = vperm.xlu1 %3095, %v112_v29   ;;  %249 = vperm.xlu0 %3094, %v111_v30   ;;  %v3127_v29 = vld [vmem:[%s4482_s1 + $0xf0] sm:$0xff]   ;;  %v154_v30 = vld [vmem:[%s4480_s2 + $0x1e8] sm:$0xff] }
  0x27   :  { %2882 = vmatmul.mubr.msk.bf16.gmra.mrb[16].mxu0 %vm643_vm0, %v3106_v31  ;;  %v153_v31 = vld [vmem:[%s4480_s2 + $0x1e0] sm:$0xff] }
  0x28   :  { %2885 = vmatprep.mubr.msk.bf16.mxu0 %vm643_vm0, %v3107_v32  ;;  %v156_v32 = vld [vmem:[%s4480_s2 + $0x1f8] sm:$0xff] }
  0x2a   :  { %264 = vperm.xlu1 %3095, %v114_v33   ;;  %259 = vperm.xlu0 %3094, %v113_v34   ;;  %v155_v33 = vld [vmem:[%s4480_s2 + $0x1f0] sm:$0xff]  ;;  %v3128_v34 = vld [vmem:[%s4482_s1 + $0xf8] sm:$0xff]  }
  0x2e   :  { %274 = vperm.xlu1 %3095, %v116_v35   ;;  %269 = vperm.xlu0 %3094, %v115_v36   ;;  %v1238_v35 = vld [vmem:[%s4483_s4 + $0x88] sm:$0xff]  ;;  %v1237_v36 = vld [vmem:[%s4483_s4 + $0x80] sm:$0xff] }
  0x2f   :  { %2886 = vmatmul.mubr.msk.bf16.gmra.mrb[20].mxu0 %vm643_vm0, %v3108_v37  ;;  %v1222_v37 = vld [vmem:[%s4483_s4 + $0x8] sm:$0xff] }
  0x30   :  { %2889 = vmatprep.mubr.msk.bf16.mxu0 %vm643_vm0, %v3109_v38  ;;  %v1221_v38 = vld [vmem:[%s4483_s4] sm:$0xff] }
  0x32   :  { %284 = vperm.xlu1 %3095, %v118_v39   ;;  %279 = vperm.xlu0 %3094, %v117_v40   ;;  %v1240_v39 = vld [vmem:[%s4483_s4 + $0x98] sm:$0xff]  ;;  %v1239_v40 = vld [vmem:[%s4483_s4 + $0x90] sm:$0xff] }
  0x36   :  { %294 = vperm.xlu1 %3095, %v120_v41   ;;  %289 = vperm.xlu0 %3094, %v119_v42   ;;  %v1224_v41 = vld [vmem:[%s4483_s4 + $0x18] sm:$0xff]  ;;  %v1223_v42 = vld [vmem:[%s4483_s4 + $0x10] sm:$0xff] }
  0x37   :  { %2890 = vmatmul.mubr.msk.bf16.gmra.mrb[24].mxu0 %vm643_vm0, %v3110_v43  ;;  %v1242_v43 = vld [vmem:[%s4483_s4 + $0xa8] sm:$0xff] }
  0x38   :  { %2893 = vmatprep.mubr.msk.bf16.mxu0 %vm643_vm0, %v3111_v44  ;;  %v1241_v44 = vld [vmem:[%s4483_s4 + $0xa0] sm:$0xff] }
  0x3a   :  { %304 = vperm.xlu1 %3095, %v122_v45   ;;  %299 = vperm.xlu0 %3094, %v121_v46   ;;  %v1226_v45 = vld [vmem:[%s4483_s4 + $0x28] sm:$0xff]  ;;  %v1225_v46 = vld [vmem:[%s4483_s4 + $0x20] sm:$0xff] }
  0x3e   :  { %314 = vperm.xlu1 %3095, %v124_v47   ;;  %309 = vperm.xlu0 %3094, %v123_v48   ;;  %v1244_v47 = vld [vmem:[%s4483_s4 + $0xb8] sm:$0xff]  ;;  %v1243_v48 = vld [vmem:[%s4483_s4 + $0xb0] sm:$0xff] }
  0x3f   :  { %2894 = vmatmul.mubr.msk.bf16.gmra.mrb[28].mxu0 %vm643_vm0, %v3112_v49 }
  0x40   :  { %2897 = vmatprep.mubr.msk.bf16.mxu0 %vm643_vm0, %v3113_v50  ;;  %v1228_v50 = vld [vmem:[%s4483_s4 + $0x38] sm:$0xff] }
  0x42   :  { %324 = vperm.xlu1 %3095, %v126_v51   ;;  %319 = vperm.xlu0 %3094, %v125_v52   ;;  %v1227_v51 = vld [vmem:[%s4483_s4 + $0x30] sm:$0xff] }
  0x46   :  { %334 = vperm.xlu1 %3095, %v128_v53   ;;  %329 = vperm.xlu0 %3094, %v127_v54   ;;  %v1246_v53 = vld [vmem:[%s4483_s4 + $0xc8] sm:$0xff]  ;;  %v1245_v54 = vld [vmem:[%s4483_s4 + $0xc0] sm:$0xff] }
  0x47   :  { %2898 = vmatmul.mubr.msk.bf16.gmra.mrb[32].mxu0 %vm643_vm0, %v3114_v55 }
  0x48   :  { %2901 = vmatprep.mubr.msk.bf16.mxu0 %vm643_vm0, %v3115_v56  ;;  %v1230_v56 = vld [vmem:[%s4483_s4 + $0x48] sm:$0xff] }
  0x4a   :  { %344 = vperm.xlu1 %3095, %v130_v57   ;;  %339 = vperm.xlu0 %3094, %v129_v58   ;;  %v3131_v58 = vld [vmem:[%s4484_s3 + $0x4] ss:$16 sps:$4 sm:$0xff]  }
  0x4b   :  { %2021 = vmatprep.mubr.bf16.mxu1 %v3131_v58 }
  0x4e   :  { %354 = vperm.xlu1 %3095, %v132_v59   ;;  %349 = vperm.xlu0 %3094, %v131_v60   ;;  %v1229_v59 = vld [vmem:[%s4483_s4 + $0x40] sm:$0xff]  ;;  %v1248_v60 = vld [vmem:[%s4483_s4 + $0xd8] sm:$0xff] }
  0x4f   :  { %2902 = vmatmul.mubr.msk.bf16.gmra.mrb[36].mxu0 %vm643_vm0, %v3116_v61  ;;  %v1247_v61 = vld [vmem:[%s4483_s4 + $0xd0] sm:$0xff] }
  0x50   :  { %2905 = vmatprep.mubr.msk.bf16.mxu0 %vm643_vm0, %v3117_v62 }
  0x52   :  { %364 = vperm.xlu1 %3095, %v134_v63   ;;  %359 = vperm.xlu0 %3094, %v133_v1   ;;  %v1232_v1 = vld [vmem:[%s4483_s4 + $0x58] sm:$0xff] }
  0x56   :  { %374 = vperm.xlu1 %3095, %v136_v2   ;;  %369 = vperm.xlu0 %3094, %v135_v3   ;;  %v1231_v2 = vld [vmem:[%s4483_s4 + $0x50] sm:$0xff] }
  0x57   :  { %2906 = vmatmul.mubr.msk.bf16.gmra.mrb[40].mxu0 %vm643_vm0, %v3118_v4  ;;  %v1250_v4 = vld [vmem:[%s4483_s4 + $0xe8] sm:$0xff] }
  0x58   :  { %2909 = vmatprep.mubr.msk.bf16.mxu0 %vm643_vm0, %v3119_v5  ;;  %v1249_v5 = vld [vmem:[%s4483_s4 + $0xe0] sm:$0xff] }
  0x5a   :  { %384 = vperm.xlu1 %3095, %v138_v6   ;;  %379 = vperm.xlu0 %3094, %v137_v7  }
  0x5e   :  { %394 = vperm.xlu1 %3095, %v140_v8   ;;  %389 = vperm.xlu0 %3094, %v139_v9   ;;  %v1234_v8 = vld [vmem:[%s4483_s4 + $0x68] sm:$0xff]  ;;  %v1233_v9 = vld [vmem:[%s4483_s4 + $0x60] sm:$0xff] }
  0x5f   :  { %2910 = vmatmul.mubr.msk.bf16.gmra.mrb[44].mxu0 %vm643_vm0, %v3120_v10 }
  0x60   :  { %2913 = vmatprep.mubr.msk.bf16.mxu0 %vm643_vm0, %v3121_v11  ;;  %v1252_v11 = vld [vmem:[%s4483_s4 + $0xf8] sm:$0xff] }
  0x62   :  { %404 = vperm.xlu1 %3095, %v142_v12   ;;  %399 = vperm.xlu0 %3094, %v141_v13   ;;  %v1251_v12 = vld [vmem:[%s4483_s4 + $0xf0] sm:$0xff] }
  0x66   :  { %414 = vperm.xlu1 %3095, %v144_v14   ;;  %409 = vperm.xlu0 %3094, %v143_v15   ;;  %v1236_v15 = vld [vmem:[%s4483_s4 + $0x78] sm:$0xff] }
  0x67   :  { %2914 = vmatmul.mubr.msk.bf16.gmra.mrb[48].mxu0 %vm643_vm0, %v3122_v16  ;;  %v1235_v16 = vld [vmem:[%s4483_s4 + $0x70] sm:$0xff] }
  0x68   :  { %2917 = vmatprep.mubr.msk.bf16.mxu0 %vm643_vm0, %v3123_v17  ;;  %v1254_v17 = vld [vmem:[%s4483_s4 + $0x108] sm:$0xff] }
  0x6a   :  { %424 = vperm.xlu1 %3095, %v146_v18   ;;  %419 = vperm.xlu0 %3094, %v145_v19   ;;  %v1253_v18 = vld [vmem:[%s4483_s4 + $0x100] sm:$0xff] }
  0x6e   :  { %434 = vperm.xlu1 %3095, %v148_v20   ;;  %429 = vperm.xlu0 %3094, %v147_v21   ;;  %v1256_v21 = vld [vmem:[%s4483_s4 + $0x118] sm:$0xff] }
  0x6f   :  { %2918 = vmatmul.mubr.msk.bf16.gmra.mrb[52].mxu0 %vm643_vm0, %v3124_v22  ;;  %v1255_v22 = vld [vmem:[%s4483_s4 + $0x110] sm:$0xff] }
  0x70   :  { %2921 = vmatprep.mubr.msk.bf16.mxu0 %vm643_vm0, %v3125_v23 }
  0x72   :  { %444 = vperm.xlu1 %3095, %v150_v24   ;;  %439 = vperm.xlu0 %3094, %v149_v25   ;;  %v1258_v25 = vld [vmem:[%s4483_s4 + $0x128] sm:$0xff] }
  0x76   :  { %454 = vperm.xlu1 %3095, %v152_v26   ;;  %449 = vperm.xlu0 %3094, %v151_v27   ;;  %v1257_v26 = vld [vmem:[%s4483_s4 + $0x120] sm:$0xff] }
  0x77   :  { %2922 = vmatmul.mubr.msk.bf16.gmra.mrb[56].mxu0 %vm643_vm0, %v3126_v28  ;;  %v1260_v28 = vld [vmem:[%s4483_s4 + $0x138] sm:$0xff] }
  0x78   :  { %2925 = vmatprep.mubr.msk.bf16.mxu0 %vm643_vm0, %v3127_v29  ;;  %v1259_v29 = vld [vmem:[%s4483_s4 + $0x130] sm:$0xff] }
  0x7a   :  { %464 = vperm.xlu1 %3095, %v154_v30   ;;  %459 = vperm.xlu0 %3094, %v153_v31   ;;  %v1262_v31 = vld [vmem:[%s4483_s4 + $0x148] sm:$0xff] }
  0x7e   :  { %474 = vperm.xlu1 %3095, %v156_v32   ;;  %469 = vperm.xlu0 %3094, %v155_v33   ;;  %v1261_v32 = vld [vmem:[%s4483_s4 + $0x140] sm:$0xff] }
  0x7f   :  { %2926 = vmatmul.mubr.msk.bf16.gmra.mrb[60].mxu0 %vm643_vm0, %v3128_v34 }
  0x81   :  { %v3693_v49 = vpop.permute.xlu0 %159  ;;  %v3701_v52 = vpop.permute.xlu1 %169 }
  0x82   :  { %1356 = vperm.xlu1 %3095, %v1238_v35   ;;  %1351 = vperm.xlu0 %3094, %v1237_v36   ;;  %v1264_v35 = vld [vmem:[%s4483_s4 + $0x158] sm:$0xff]  ;;  %v1263_v36 = vld [vmem:[%s4483_s4 + $0x150] sm:$0xff] }
  0x85   :  { %v3709_v55 = vpop.permute.xlu0 %164  ;;  %v3714_v57 = vpop.permute.xlu1 %174 }
  0x86   :  { %1276 = vperm.xlu1 %3095, %v1222_v37   ;;  %1271 = vperm.xlu0 %3094, %v1221_v38   ;;  %v1266_v38 = vld [vmem:[%s4483_s4 + $0x168] sm:$0xff] }
  0x89   :  { %v3728_v62 = vpop.permute.xlu0 %179  ;;  %v3730_v63 = vpop.permute.xlu1 %184 }
  0x8a   :  { %1366 = vperm.xlu1 %3095, %v1240_v39   ;;  %1361 = vperm.xlu0 %3094, %v1239_v40   ;;  %v1265_v39 = vld [vmem:[%s4483_s4 + $0x160] sm:$0xff] }
  0x8d   :  { %v3738_v3 = vpop.permute.xlu0 %189  ;;  %v3746_v6 = vpop.permute.xlu1 %194 }
  0x8e   :  { %1286 = vperm.xlu1 %3095, %v1224_v41   ;;  %1281 = vperm.xlu0 %3094, %v1223_v42   ;;  %v1268_v42 = vld [vmem:[%s4483_s4 + $0x178] sm:$0xff] }
  0x91   :  { %v3748_v7 = vpop.permute.xlu0 %199  ;;  %v3756_v10 = vpop.permute.xlu1 %204 }
  0x92   :  { %1376 = vperm.xlu1 %3095, %v1242_v43   ;;  %1371 = vperm.xlu0 %3094, %v1241_v44   ;;  %v1267_v43 = vld [vmem:[%s4483_s4 + $0x170] sm:$0xff] }
  0x95   :  { %v3764_v13 = vpop.permute.xlu0 %209  ;;  %v3766_v14 = vpop.permute.xlu1 %214 }
  0x96   :  { %1296 = vperm.xlu1 %3095, %v1226_v45   ;;  %1291 = vperm.xlu0 %3094, %v1225_v46  }
  0x99   :  { %v3780_v19 = vpop.permute.xlu0 %219  ;;  %v3782_v20 = vpop.permute.xlu1 %224 }
  0x9a   :  { %1386 = vperm.xlu1 %3095, %v1244_v47   ;;  %1381 = vperm.xlu0 %3094, %v1243_v48  }
  0x9d   :  { %v3790_v23 = vpop.permute.xlu0 %229  ;;  %v3792_v24 = vpop.permute.xlu1 %234 }
  0x9e   :  { %1306 = vperm.xlu1 %3095, %v1228_v50   ;;  %1301 = vperm.xlu0 %3094, %v1227_v51  }
  0xa1   :  { %v3800_v27 = vpop.permute.xlu0 %239  ;;  %v3808_v30 = vpop.permute.xlu1 %244 }
  0xa2   :  { %1396 = vperm.xlu1 %3095, %v1246_v53   ;;  %1391 = vperm.xlu0 %3094, %v1245_v54   ;;  %v2516_v54 = vld [vmem:[%s4485_s6 + $0x8] sm:$0xff] }
  0xa5   :  { %v3816_v33 = vpop.permute.xlu0 %249  ;;  %v3818_v34 = vpop.permute.xlu1 %254 }
  0xa6   :  { %1316 = vperm.xlu1 %3095, %v1230_v56   ;;  %1311 = vperm.xlu0 %3094, %v1229_v59   ;;  %v2515_v56 = vld [vmem:[%s4485_s6] sm:$0xff] }
  0xa9   :  { %v3826_v37 = vpop.permute.xlu0 %259  ;;  %v3834_v40 = vpop.permute.xlu1 %264 }
  0xaa   :  { %1406 = vperm.xlu1 %3095, %v1248_v60   ;;  %1401 = vperm.xlu0 %3094, %v1247_v61  }
  0xad   :  { %v3842_v44 = vpop.permute.xlu0 %269  ;;  %v3845_v47 = vpop.permute.xlu1 %274 }
  0xae   :  { %1326 = vperm.xlu1 %3095, %v1232_v1   ;;  %1321 = vperm.xlu0 %3094, %v1231_v2   ;;  %v3157_v2 = vld [vmem:[%s4484_s3 + $0xc] ss:$16 sps:$4 sm:$0xff]  }
  0xaf   :  { %2246 = vmatprep.mubr.bf16.mxu0 %v3157_v2 }
  0xb1   :  { %v3856_v60 = vpop.permute.xlu0 %279 }
  0xb2   :  { %1416 = vperm.xlu1 %3095, %v1250_v4   ;;  %1411 = vperm.xlu0 %3094, %v1249_v5   ;;  %v3861_v4 = vpop.permute.xlu1 %284 }
  0xb6   :  { %1336 = vperm.xlu1 %3095, %v1234_v8   ;;  %1331 = vperm.xlu0 %3094, %v1233_v9  }
  0xba   :  { %1426 = vperm.xlu1 %3095, %v1252_v11   ;;  %1421 = vperm.xlu0 %3094, %v1251_v12  }
  0xbe   :  { %1346 = vperm.xlu1 %3095, %v1236_v15   ;;  %1341 = vperm.xlu0 %3094, %v1235_v16   ;;  %v3867_v16 = vpop.permute.xlu0 %289 }
  0xc2   :  { %1436 = vperm.xlu1 %3095, %v1254_v17   ;;  %1431 = vperm.xlu0 %3094, %v1253_v18  }
  0xc6   :  { %1446 = vperm.xlu1 %3095, %v1256_v21   ;;  %1441 = vperm.xlu0 %3094, %v1255_v22   ;;  %v3870_v22 = vpop.permute.xlu1 %294 }
  0xca   :  { %1456 = vperm.xlu1 %3095, %v1258_v25   ;;  %1451 = vperm.xlu0 %3094, %v1257_v26  }
  0xce   :  { %1466 = vperm.xlu1 %3095, %v1260_v28   ;;  %1461 = vperm.xlu0 %3094, %v1259_v29  }
  0xd2   :  { %1476 = vperm.xlu1 %3095, %v1262_v31   ;;  %1471 = vperm.xlu0 %3094, %v1261_v32   ;;  %v3874_v31 = vpop.permute.xlu0 %299 }
  0xd6   :  { %1486 = vperm.xlu1 %3095, %v1264_v35   ;;  %1481 = vperm.xlu0 %3094, %v1263_v36  }
  0xda   :  { %1496 = vperm.xlu1 %3095, %v1266_v38   ;;  %1491 = vperm.xlu0 %3094, %v1265_v39   ;;  %v2867_v41 = vpop.f32.mrb[0].mxu0  ;;  %v3879_v38 = vpop.permute.xlu1 %304 }
  0xdb   :  { %v774_v45 = vpop.f32.mrb[1].mxu0  ;;  %v783_v46 = vadd.f32 %v2867_v41, %v3701_v52 }
  0xdc   :  { %v775_v48 = vadd.f32 %v774_v45, %v3693_v49  ;;  %v2868_v50 = vpop.f32.mrb[2].mxu0 }
  0xdd   :  { %v786_v51 = vadd.f32 %v2868_v50, %v3714_v57  ;;  %v777_v53 = vpop.f32.mrb[3].mxu0  ;;  %v1031_v58 = vmax.f32 %v783_v46, 0.0 }
  0xde   :  { %1506 = vperm.xlu1 %3095, %v1268_v42   ;;  %1501 = vperm.xlu0 %3094, %v1267_v43   ;;  %v778_v52 = vadd.f32 %v777_v53, %v3709_v55  ;;  %v1029_v49 = vmax.f32 %v775_v48, 0.0 }
  0xdf   :  { %v1032_v59 = vmax.f32 %v786_v51, 0.0  ;;  %v3886_v51 = vpop.permute.xlu1 %314 }
  0xe0   :  { %v1030_v61 = vmax.f32 %v778_v52, 0.0 }
  0xe1   :  { %v1094_v57 = vpack.c.bf16 %v1032_v59, %v1031_v58 }
  0xe2   :  { %2524 = vperm.xlu1 %3095, %v2516_v54   ;;  %2519 = vperm.xlu0 %3094, %v2515_v56   ;;  %v2871_v1 = vpop.f32.mrb[4].mxu0  ;;  %v1093_v8 = vpack.c.bf16 %v1030_v61, %v1029_v49 }
  0xe3   :  { %v790_v5 = vpop.f32.mrb[5].mxu0  ;;  %v799_v55 = vadd.f32 %v2871_v1, %v3738_v3 }
  0xe4   :  { %v791_v9 = vadd.f32 %v790_v5, %v3728_v62  ;;  %v2872_v11 = vpop.f32.mrb[6].mxu0  ;;  %1990 = vmatpush1.bf16.msra.mxu1 %v1093_v8 }
  0xe5   :  { %v802_v12 = vadd.f32 %v2872_v11, %v3746_v6  ;;  %v793_v15 = vpop.f32.mrb[7].mxu0  ;;  %1991 = vmatprep.subr.bf16.mxu1 %v3281_v0  ;;  %v1035_v18 = vmax.f32 %v799_v55, 0.0 }
  0xe6   :  { %v794_v17 = vadd.f32 %v793_v15, %v3730_v63  ;;  %v1033_v25 = vmax.f32 %v791_v9, 0.0 }
  0xe7   :  { %v1036_v21 = vmax.f32 %v802_v12, 0.0 }
  0xe8   :  { %v1034_v3 = vmax.f32 %v794_v17, 0.0  ;;  %1992 = vmatpush1.bf16.msra.mxu1 %v1094_v57 }
  0xe9   :  { %v1096_v26 = vpack.c.bf16 %v1036_v21, %v1035_v18  ;;  %1993 = vmatprep.subr.bf16.mxu1 %v3281_v0 }
  0xea   :  { %v2875_v62 = vpop.f32.mrb[8].mxu0  ;;  %v1095_v28 = vpack.c.bf16 %v1034_v3, %v1033_v25 }
  0xeb   :  { %v806_v6 = vpop.f32.mrb[9].mxu0  ;;  %v815_v29 = vadd.f32 %v2875_v62, %v3764_v13 }
  0xec   :  { %v807_v32 = vadd.f32 %v806_v6, %v3748_v7  ;;  %v2876_v63 = vpop.f32.mrb[10].mxu0  ;;  %1994 = vmatpush1.bf16.msra.mxu1 %v1095_v28  ;;  %v3883_v7 = vpop.permute.xlu0 %309 }
  0xed   :  { %v818_v35 = vadd.f32 %v2876_v63, %v3766_v14  ;;  %v809_v36 = vpop.f32.mrb[11].mxu0  ;;  %1995 = vmatprep.subr.bf16.mxu1 %v3281_v0  ;;  %v1039_v41 = vmax.f32 %v815_v29, 0.0 }
  0xee   :  { %v810_v39 = vadd.f32 %v809_v36, %v3756_v10  ;;  %v1037_v43 = vmax.f32 %v807_v32, 0.0 }
  0xef   :  { %v1040_v42 = vmax.f32 %v818_v35, 0.0 }
  0xf0   :  { %v1038_v45 = vmax.f32 %v810_v39, 0.0  ;;  %1996 = vmatpush1.bf16.msra.mxu1 %v1096_v26  ;;  %v3892_v49 = vpop.permute.xlu0 %319 }
  0xf1   :  { %v1098_v13 = vpack.c.bf16 %v1040_v42, %v1039_v41  ;;  %1997 = vmatprep.subr.bf16.mxu1 %v3281_v0 }
  0xf2   :  { %v2879_v46 = vpop.f32.mrb[12].mxu0  ;;  %v1097_v48 = vpack.c.bf16 %v1038_v45, %v1037_v43 }
  0xf3   :  { %v822_v14 = vpop.f32.mrb[13].mxu0  ;;  %v831_v50 = vadd.f32 %v2879_v46, %v3790_v23 }
  0xf4   :  { %v823_v53 = vadd.f32 %v822_v14, %v3780_v19  ;;  %v2880_v10 = vpop.f32.mrb[14].mxu0  ;;  %1998 = vmatpush1.bf16.msra.mxu1 %v1097_v48  ;;  %v3895_v19 = vpop.permute.xlu1 %324 }
  0xf5   :  { %v834_v54 = vadd.f32 %v2880_v10, %v3792_v24  ;;  %v825_v56 = vpop.f32.mrb[15].mxu0  ;;  %1999 = vmatprep.subr.bf16.mxu1 %v3281_v0  ;;  %v1043_v58 = vmax.f32 %v831_v50, 0.0  ;;  %v3901_v11 = vpop.permute.xlu0 %329 }
  0xf6   :  { %v826_v52 = vadd.f32 %v825_v56, %v3782_v20  ;;  %v1041_v61 = vmax.f32 %v823_v53, 0.0 }
  0xf7   :  { %v1044_v59 = vmax.f32 %v834_v54, 0.0 }
  0xf8   :  { %v1042_v57 = vmax.f32 %v826_v52, 0.0  ;;  %2000 = vmatpush1.bf16.msra.mxu1 %v1098_v13  ;;  %v3904_v18 = vpop.permute.xlu1 %334 }
  0xf9   :  { %v1100_v23 = vpack.c.bf16 %v1044_v59, %v1043_v58  ;;  %2001 = vmatprep.subr.bf16.mxu1 %v3281_v0  ;;  %v3908_v62 = vpop.permute.xlu0 %339 }
  0xfa   :  { %v2883_v1 = vpop.f32.mrb[16].mxu0  ;;  %v1099_v2 = vpack.c.bf16 %v1042_v57, %v1041_v61 }
  0xfb   :  { %v838_v24 = vpop.f32.mrb[17].mxu0  ;;  %v847_v5 = vadd.f32 %v2883_v1, %v3816_v33 }
  0xfc   :  { %v839_v8 = vadd.f32 %v838_v24, %v3800_v27  ;;  %v2884_v20 = vpop.f32.mrb[18].mxu0  ;;  %2002 = vmatpush1.bf16.msra.mxu1 %v1099_v2  ;;  %v3913_v32 = vpop.permute.xlu1 %344 }
  0xfd   :  { %v850_v55 = vadd.f32 %v2884_v20, %v3818_v34  ;;  %v841_v9 = vpop.f32.mrb[19].mxu0  ;;  %2003 = vmatprep.subr.bf16.mxu1 %v3281_v0  ;;  %v1047_v15 = vmax.f32 %v847_v5, 0.0 }
  0xfe   :  { %v842_v12 = vadd.f32 %v841_v9, %v3808_v30  ;;  %v1045_v21 = vmax.f32 %v839_v8, 0.0 }
  0xff   :  { %v1048_v17 = vmax.f32 %v850_v55, 0.0 }
 0x100   :  { %v1046_v25 = vmax.f32 %v842_v12, 0.0  ;;  %2004 = vmatpush1.bf16.msra.mxu1 %v1100_v23  ;;  %v3920_v13 = vpop.permute.xlu1 %354 }
 0x101   :  { %v1102_v33 = vpack.c.bf16 %v1048_v17, %v1047_v15  ;;  %2005 = vmatprep.subr.bf16.mxu1 %v3281_v0 }
 0x102   :  { %v2887_v27 = vpop.f32.mrb[20].mxu0  ;;  %v1101_v3 = vpack.c.bf16 %v1046_v25, %v1045_v21 }
 0x103   :  { %v854_v34 = vpop.f32.mrb[21].mxu0  ;;  %v863_v26 = vadd.f32 %v2887_v27, %v3842_v44 }
 0x104   :  { %v855_v28 = vadd.f32 %v854_v34, %v3826_v37  ;;  %v2888_v30 = vpop.f32.mrb[22].mxu0  ;;  %2006 = vmatpush1.bf16.msra.mxu1 %v1101_v3  ;;  %v3917_v37 = vpop.permute.xlu0 %349 }
 0x105   :  { %v866_v6 = vadd.f32 %v2888_v30, %v3845_v47  ;;  %v857_v29 = vpop.f32.mrb[23].mxu0  ;;  %2007 = vmatprep.subr.bf16.mxu1 %v3281_v0  ;;  %v1051_v35 = vmax.f32 %v863_v26, 0.0 }
 0x106   :  { %v858_v63 = vadd.f32 %v857_v29, %v3834_v40  ;;  %v1049_v39 = vmax.f32 %v855_v28, 0.0 }
 0x107   :  { %v1052_v36 = vmax.f32 %v866_v6, 0.0 }
 0x108   :  { %v1050_v41 = vmax.f32 %v858_v63, 0.0  ;;  %2008 = vmatpush1.bf16.msra.mxu1 %v1102_v33  ;;  %v3926_v54 = vpop.permute.xlu0 %359 }
 0x109   :  { %v1104_v44 = vpack.c.bf16 %v1052_v36, %v1051_v35  ;;  %2009 = vmatprep.subr.bf16.mxu1 %v3281_v0 }
 0x10a   :  { %v2891_v42 = vpop.f32.mrb[24].mxu0  ;;  %v1103_v43 = vpack.c.bf16 %v1050_v41, %v1049_v39 }
 0x10b   :  { %v870_v47 = vpop.f32.mrb[25].mxu0  ;;  %v879_v45 = vadd.f32 %v2891_v42, %v3867_v16 }
 0x10c   :  { %v871_v46 = vadd.f32 %v870_v47, %v3856_v60  ;;  %v2892_v40 = vpop.f32.mrb[26].mxu0  ;;  %2010 = vmatpush1.bf16.msra.mxu1 %v1103_v43  ;;  %v3929_v60 = vpop.permute.xlu1 %364 }
 0x10d   :  { %v882_v48 = vadd.f32 %v2892_v40, %v3870_v22  ;;  %v873_v14 = vpop.f32.mrb[27].mxu0  ;;  %2011 = vmatprep.subr.bf16.mxu1 %v3281_v0  ;;  %v1055_v53 = vmax.f32 %v879_v45, 0.0  ;;  %v3935_v2 = vpop.permute.xlu0 %369 }
 0x10e   :  { %v874_v50 = vadd.f32 %v873_v14, %v3861_v4  ;;  %v1053_v56 = vmax.f32 %v871_v46, 0.0 }
 0x10f   :  { %v1056_v10 = vmax.f32 %v882_v48, 0.0 }
 0x110   :  { %v1054_v52 = vmax.f32 %v874_v50, 0.0  ;;  %2012 = vmatpush1.bf16.msra.mxu1 %v1104_v44  ;;  %v3938_v20 = vpop.permute.xlu1 %374 }
 0x111   :  { %v1106_v16 = vpack.c.bf16 %v1056_v10, %v1055_v53  ;;  %2013 = vmatprep.subr.bf16.mxu1 %v3281_v0  ;;  %v3942_v17 = vpop.permute.xlu0 %379  ;;  %v3135_v53 = vld [vmem:[%s4484_s3 + $0x44] ss:$16 sps:$4 sm:$0xff]  }
 0x112   :  { %v2895_v58 = vpop.f32.mrb[28].mxu0  ;;  %v1105_v59 = vpack.c.bf16 %v1054_v52, %v1053_v56 }
 0x113   :  { %v886_v22 = vpop.f32.mrb[29].mxu0  ;;  %v895_v61 = vadd.f32 %v2895_v58, %v3883_v7 }
 0x114   :  { %v887_v57 = vadd.f32 %v886_v22, %v3874_v31  ;;  %v2896_v4 = vpop.f32.mrb[30].mxu0  ;;  %2014 = vmatpush1.bf16.msra.mxu1 %v1105_v59  ;;  %v3947_v27 = vpop.permute.xlu1 %384 }
 0x115   :  { %v898_v23 = vadd.f32 %v2896_v4, %v3886_v51  ;;  %v889_v1 = vpop.f32.mrb[31].mxu0  ;;  %2015 = vmatprep.subr.bf16.mxu1 %v3281_v0  ;;  %v1059_v5 = vmax.f32 %v895_v61, 0.0 }
 0x116   :  { %v890_v24 = vadd.f32 %v889_v1, %v3879_v38  ;;  %v1057_v55 = vmax.f32 %v887_v57, 0.0 }
 0x117   :  { %v1060_v8 = vmax.f32 %v898_v23, 0.0 }
 0x118   :  { %v1058_v9 = vmax.f32 %v890_v24, 0.0  ;;  %2016 = vmatpush1.bf16.msra.mxu1 %v1106_v16  ;;  %v395_v36 = vpop.permute.xlu1 %394 }
 0x119   :  { %v1108_v7 = vpack.c.bf16 %v1060_v8, %v1059_v5  ;;  %2017 = vmatprep.subr.bf16.mxu1 %v3281_v0  ;;  %v3138_v8 = vld [vmem:[%s4484_s3 + $0x64] ss:$16 sps:$4 sm:$0xff]  }
 0x11a   :  { %v2899_v31 = vpop.f32.mrb[32].mxu0  ;;  %v1107_v12 = vpack.c.bf16 %v1058_v9, %v1057_v55 }
 0x11b   :  { %v902_v51 = vpop.f32.mrb[33].mxu0  ;;  %v911_v15 = vadd.f32 %v2899_v31, %v3901_v11  ;;  %v3129_v11 = vld [vmem:[%s4484_s3] ss:$16 sps:$4 sm:$0xff]  }
 0x11c   :  { %v903_v21 = vadd.f32 %v902_v51, %v3892_v49  ;;  %v2900_v38 = vpop.f32.mrb[34].mxu0  ;;  %2018 = vmatpush1.bf16.msra.mxu1 %v1107_v12 }
 0x11d   :  { %v914_v25 = vadd.f32 %v2900_v38, %v3904_v18  ;;  %v905_v33 = vpop.f32.mrb[35].mxu0  ;;  %2019 = vmatprep.subr.bf16.mxu1 %v3281_v0  ;;  %v1063_v34 = vmax.f32 %v911_v15, 0.0  ;;  %v390_v18 = vpop.permute.xlu0 %389 }
 0x11e   :  { %v906_v3 = vadd.f32 %v905_v33, %v3895_v19  ;;  %v1061_v28 = vmax.f32 %v903_v21, 0.0  ;;  %v3132_v19 = vld [vmem:[%s4484_s3 + $0x24] ss:$16 sps:$4 sm:$0xff]  }
 0x11f   :  { %v1064_v26 = vmax.f32 %v914_v25, 0.0  ;;  %v3140_v25 = vld [vmem:[%s4484_s3 + $0x60] ss:$16 sps:$4 sm:$0xff]  }
 0x120   :  { %v1062_v30 = vmax.f32 %v906_v3, 0.0  ;;  %2020 = vmatpush1.bf16.msra.mxu1 %v1108_v7 }
 0x121   :  { %v1110_v49 = vpack.c.bf16 %v1064_v26, %v1063_v34  ;;  %2949 = vmatprep.subr.bf16.mxu1 %v3281_v0 }
 0x122   :  { %v2903_v6 = vpop.f32.mrb[36].mxu0  ;;  %v1109_v29 = vpack.c.bf16 %v1062_v30, %v1061_v28  ;;  %v3141_v28 = vld [vmem:[%s4484_s3 + $0x84] ss:$16 sps:$4 sm:$0xff]  }
 0x123   :  { %v918_v63 = vpop.f32.mrb[37].mxu0  ;;  %v927_v35 = vadd.f32 %v2903_v6, %v3917_v37  ;;  %2022 = vmatmul.mubr.bf16.vlgmr.msra.gmra.mrb[0].mxu1 %v3129_v11  ;;  %v3134_v37 = vld [vmem:[%s4484_s3 + $0x20] ss:$16 sps:$4 sm:$0xff]  }
 0x124   :  { %v919_v39 = vadd.f32 %v918_v63, %v3908_v62  ;;  %v2904_v41 = vpop.f32.mrb[38].mxu0  ;;  %2215 = vmatpush1.bf16.msra.mxu0 %v1109_v29  ;;  %2965 = vmatpush1.bf16.msra.mxu1 %v1109_v29  ;;  %v3966_v62 = vpop.permute.xlu0 %399 }
 0x125   :  { %v930_v44 = vadd.f32 %v2904_v41, %v3920_v13  ;;  %v921_v42 = vpop.f32.mrb[39].mxu0  ;;  %2216 = vmatprep.subr.bf16.mxu0 %v3281_v0  ;;  %2950 = vmatprep.subr.bf16.mxu1 %v3281_v0  ;;  %v1067_v47 = vmax.f32 %v927_v35, 0.0 }
 0x126   :  { %v922_v43 = vadd.f32 %v921_v42, %v3913_v32  ;;  %2029 = vmatprep.mubr.bf16.mxu1 %v3132_v19  ;;  %v1065_v46 = vmax.f32 %v919_v39, 0.0  ;;  %v3970_v32 = vpop.permute.xlu1 %404  ;;  %v3143_v39 = vld [vmem:[%s4484_s3 + $0x80] ss:$16 sps:$4 sm:$0xff]  }
 0x127   :  { %v1068_v45 = vmax.f32 %v930_v44, 0.0 }
 0x128   :  { %v1066_v40 = vmax.f32 %v922_v43, 0.0  ;;  %2217 = vmatpush1.bf16.msra.mxu0 %v1110_v49  ;;  %2966 = vmatpush1.bf16.msra.mxu1 %v1110_v49  ;;  %v410_v59 = vpop.permute.xlu0 %409 }
 0x129   :  { %v1112_v13 = vpack.c.bf16 %v1068_v45, %v1067_v47  ;;  %2218 = vmatprep.subr.bf16.mxu0 %v3281_v0  ;;  %2951 = vmatprep.subr.bf16.mxu1 %v3281_v0 }
 0x12a   :  { %v2907_v48 = vpop.f32.mrb[40].mxu0  ;;  %v1111_v14 = vpack.c.bf16 %v1066_v40, %v1065_v46  ;;  %v415_v4 = vpop.permute.xlu1 %414  ;;  %v3144_v46 = vld [vmem:[%s4484_s3 + $0xa4] ss:$16 sps:$4 sm:$0xff]  }
 0x12b   :  { %v934_v50 = vpop.f32.mrb[41].mxu0  ;;  %v943_v10 = vadd.f32 %v2907_v48, %v3935_v2  ;;  %2030 = vmatmul.mubr.bf16.gmra.mrb[4].mxu1 %v3134_v37 }
 0x12c   :  { %v935_v56 = vadd.f32 %v934_v50, %v3926_v54  ;;  %v2908_v52 = vpop.f32.mrb[42].mxu0  ;;  %2219 = vmatpush1.bf16.msra.mxu0 %v1111_v14  ;;  %2967 = vmatpush1.bf16.msra.mxu1 %v1111_v14  ;;  %v3137_v54 = vld [vmem:[%s4484_s3 + $0x40] ss:$16 sps:$4 sm:$0xff]   ;;  %v420_v55 = vpop.permute.xlu0 %419 }
 0x12d   :  { %v946_v16 = vadd.f32 %v2908_v52, %v3938_v20  ;;  %v937_v58 = vpop.f32.mrb[43].mxu0  ;;  %2220 = vmatprep.subr.bf16.mxu0 %v3281_v0  ;;  %2952 = vmatprep.subr.bf16.mxu1 %v3281_v0  ;;  %v1071_v61 = vmax.f32 %v943_v10, 0.0  ;;  %v3146_v52 = vld [vmem:[%s4484_s3 + $0xa0] ss:$16 sps:$4 sm:$0xff]  }
 0x12e   :  { %v938_v22 = vadd.f32 %v937_v58, %v3929_v60  ;;  %2037 = vmatprep.mubr.bf16.mxu1 %v3135_v53  ;;  %v1069_v23 = vmax.f32 %v935_v56, 0.0  ;;  %v425_v51 = vpop.permute.xlu1 %424 }
 0x12f   :  { %v1072_v57 = vmax.f32 %v946_v16, 0.0 }
 0x130   :  { %v1070_v1 = vmax.f32 %v938_v22, 0.0  ;;  %2221 = vmatpush1.bf16.msra.mxu0 %v1112_v13  ;;  %2968 = vmatpush1.bf16.msra.mxu1 %v1112_v13  ;;  %v430_v26 = vpop.permute.xlu0 %429 }
 0x131   :  { %v1114_v2 = vpack.c.bf16 %v1072_v57, %v1071_v61  ;;  %2222 = vmatprep.subr.bf16.mxu0 %v3281_v0  ;;  %2953 = vmatprep.subr.bf16.mxu1 %v3281_v0 }
 0x132   :  { %v2911_v24 = vpop.f32.mrb[44].mxu0  ;;  %v1113_v5 = vpack.c.bf16 %v1070_v1, %v1069_v23  ;;  %v435_v49 = vpop.permute.xlu1 %434 }
 0x133   :  { %v950_v60 = vpop.f32.mrb[45].mxu0  ;;  %v959_v20 = vadd.f32 %v2911_v24, %v390_v18  ;;  %2038 = vmatmul.mubr.bf16.gmra.mrb[8].mxu1 %v3137_v54 }
 0x134   :  { %v951_v9 = vadd.f32 %v950_v60, %v3942_v17  ;;  %v2912_v7 = vpop.f32.mrb[46].mxu0  ;;  %2223 = vmatpush1.bf16.msra.mxu0 %v1113_v5  ;;  %2969 = vmatpush1.bf16.msra.mxu1 %v1113_v5  ;;  %v440_v41 = vpop.permute.xlu0 %439 }
 0x135   :  { %v962_v31 = vadd.f32 %v2912_v7, %v395_v36  ;;  %v953_v12 = vpop.f32.mrb[47].mxu0  ;;  %2224 = vmatprep.subr.bf16.mxu0 %v3281_v0  ;;  %2954 = vmatprep.subr.bf16.mxu1 %v3281_v0  ;;  %v1075_v21 = vmax.f32 %v959_v20, 0.0  ;;  %v3149_v7 = vld [vmem:[%s4484_s3 + $0xc0] ss:$16 sps:$4 sm:$0xff]  }
 0x136   :  { %v954_v15 = vadd.f32 %v953_v12, %v3947_v27  ;;  %2045 = vmatprep.mubr.bf16.mxu1 %v3138_v8  ;;  %v1073_v17 = vmax.f32 %v951_v9, 0.0  ;;  %v445_v45 = vpop.permute.xlu1 %444 }
 0x137   :  { %v1076_v38 = vmax.f32 %v962_v31, 0.0 }
 0x138   :  { %v1074_v33 = vmax.f32 %v954_v15, 0.0  ;;  %2225 = vmatpush1.bf16.msra.mxu0 %v1114_v2  ;;  %2970 = vmatpush1.bf16.msra.mxu1 %v1114_v2  ;;  %v450_v50 = vpop.permute.xlu0 %449 }
 0x139   :  { %v1116_v3 = vpack.c.bf16 %v1076_v38, %v1075_v21  ;;  %2226 = vmatprep.subr.bf16.mxu0 %v3281_v0  ;;  %2955 = vmatprep.subr.bf16.mxu1 %v3281_v0 }
 0x13a   :  { %v2915_v34 = vpop.f32.mrb[48].mxu0  ;;  %v1115_v11 = vpack.c.bf16 %v1074_v33, %v1073_v17  ;;  %v455_v16 = vpop.permute.xlu1 %454  ;;  %v3150_v17 = vld [vmem:[%s4484_s3 + $0xe4] ss:$16 sps:$4 sm:$0xff]  }
 0x13b   :  { %v966_v27 = vpop.f32.mrb[49].mxu0  ;;  %v975_v30 = vadd.f32 %v2915_v34, %v410_v59  ;;  %2046 = vmatmul.mubr.bf16.gmra.mrb[12].mxu1 %v3140_v25 }
 0x13c   :  { %v967_v6 = vadd.f32 %v966_v27, %v3966_v62  ;;  %v2916_v18 = vpop.f32.mrb[50].mxu0  ;;  %2227 = vmatpush1.bf16.msra.mxu0 %v1115_v11  ;;  %2971 = vmatpush1.bf16.msra.mxu1 %v1115_v11  ;;  %v460_v1 = vpop.permute.xlu0 %459 }
 0x13d   :  { %v978_v29 = vadd.f32 %v2916_v18, %v415_v4  ;;  %v969_v63 = vpop.f32.mrb[51].mxu0  ;;  %2228 = vmatprep.subr.bf16.mxu0 %v3281_v0  ;;  %2956 = vmatprep.subr.bf16.mxu1 %v3281_v0  ;;  %v1079_v35 = vmax.f32 %v975_v30, 0.0  ;;  %v3147_v4 = vld [vmem:[%s4484_s3 + $0xc4] ss:$16 sps:$4 sm:$0xff]  }
 0x13e   :  { %v970_v19 = vadd.f32 %v969_v63, %v3970_v32  ;;  %2053 = vmatprep.mubr.bf16.mxu1 %v3141_v28  ;;  %v1077_v44 = vmax.f32 %v967_v6, 0.0  ;;  %v465_v8 = vpop.permute.xlu1 %464  ;;  %v3152_v6 = vld [vmem:[%s4484_s3 + $0xe0] ss:$16 sps:$4 sm:$0xff]  }
 0x13f   :  { %v1080_v36 = vmax.f32 %v978_v29, 0.0 }
 0x140   :  { %v1078_v42 = vmax.f32 %v970_v19, 0.0  ;;  %2229 = vmatpush1.bf16.msra.mxu0 %v1116_v3  ;;  %2972 = vmatpush1.bf16.msra.mxu1 %v1116_v3  ;;  %v470_v21 = vpop.permute.xlu0 %469 }
 0x141   :  { %v1118_v43 = vpack.c.bf16 %v1080_v36, %v1079_v35  ;;  %2230 = vmatprep.subr.bf16.mxu0 %v3281_v0  ;;  %2957 = vmatprep.subr.bf16.mxu1 %v3281_v0  ;;  %v3153_v35 = vld [vmem:[%s4484_s3 + $0x104] ss:$16 sps:$4 sm:$0xff]   ;;  %v3155_v36 = vld [vmem:[%s4484_s3 + $0x8] ss:$16 sps:$4 sm:$0xff]  }
 0x142   :  { %v2919_v47 = vpop.f32.mrb[52].mxu0  ;;  %v1117_v37 = vpack.c.bf16 %v1078_v42, %v1077_v44  ;;  %v475_v3 = vpop.permute.xlu1 %474  ;;  %v3161_v44 = vld [vmem:[%s4484_s3 + $0x2c] ss:$16 sps:$4 sm:$0xff]   ;;  %v3164_v42 = vld [vmem:[%s4484_s3 + $0x28] ss:$16 sps:$4 sm:$0xff]  }
 0x143   :  { %v982_v62 = vpop.f32.mrb[53].mxu0  ;;  %v991_v40 = vadd.f32 %v2919_v47, %v430_v26  ;;  %2054 = vmatmul.mubr.bf16.gmra.mrb[16].mxu1 %v3143_v39  ;;  %v3158_v39 = vld [vmem:[%s4484_s3 + $0x100] ss:$16 sps:$4 sm:$0xff]   ;;  %v3167_v47 = vld [vmem:[%s4484_s3 + $0x4c] ss:$16 sps:$4 sm:$0xff]  }
 0x144   :  { %v983_v13 = vadd.f32 %v982_v62, %v420_v55  ;;  %v2920_v48 = vpop.f32.mrb[54].mxu0  ;;  %2231 = vmatpush1.bf16.msra.mxu0 %v1117_v37  ;;  %2973 = vmatpush1.bf16.msra.mxu1 %v1117_v37  ;;  %v3170_v37 = vld [vmem:[%s4484_s3 + $0x48] ss:$16 sps:$4 sm:$0xff]   ;;  %v3171_v62 = vld [vmem:[%s4484_s3 + $0x164] ss:$16 sps:$4 sm:$0xff]  }
 0x145   :  { %v994_v32 = vadd.f32 %v2920_v48, %v435_v49  ;;  %v985_v14 = vpop.f32.mrb[55].mxu0  ;;  %2232 = vmatprep.subr.bf16.mxu0 %v3281_v0  ;;  %2958 = vmatprep.subr.bf16.mxu1 %v3281_v0  ;;  %v1083_v10 = vmax.f32 %v991_v40, 0.0  ;;  %v3175_v40 = vld [vmem:[%s4484_s3 + $0x160] ss:$16 sps:$4 sm:$0xff]   ;;  %v3177_v48 = vld [vmem:[%s4484_s3 + $0x184] ss:$16 sps:$4 sm:$0xff]  }
 0x146   :  { %v986_v53 = vadd.f32 %v985_v14, %v425_v51  ;;  %2061 = vmatprep.mubr.bf16.mxu1 %v3144_v46  ;;  %v1081_v58 = vmax.f32 %v983_v13, 0.0  ;;  %v3173_v46 = vld [vmem:[%s4484_s3 + $0x6c] ss:$16 sps:$4 sm:$0xff]   ;;  %v3176_v13 = vld [vmem:[%s4484_s3 + $0x68] ss:$16 sps:$4 sm:$0xff]  }
 0x147   :  { %v1084_v56 = vmax.f32 %v994_v32, 0.0  ;;  %v3179_v32 = vld [vmem:[%s4484_s3 + $0x8c] ss:$16 sps:$4 sm:$0xff]   ;;  %v3181_v14 = vld [vmem:[%s4484_s3 + $0x180] ss:$16 sps:$4 sm:$0xff]  }
 0x148   :  { %v1082_v59 = vmax.f32 %v986_v53, 0.0  ;;  %2233 = vmatpush1.bf16.msra.mxu0 %v1118_v43  ;;  %2974 = vmatpush1.bf16.msra.mxu1 %v1118_v43  ;;  %v3165_v43 = vld [vmem:[%s4484_s3 + $0x144] ss:$16 sps:$4 sm:$0xff]  }
 0x149   :  { %v1120_v22 = vpack.c.bf16 %v1084_v56, %v1083_v10  ;;  %2234 = vmatprep.subr.bf16.mxu0 %v3281_v0  ;;  %2959 = vmatprep.subr.bf16.mxu1 %v3281_v0  ;;  %v3183_v53 = vld [vmem:[%s4484_s3 + $0x1a4] ss:$16 sps:$4 sm:$0xff]   ;;  %v3185_v10 = vld [vmem:[%s4484_s3 + $0xac] ss:$16 sps:$4 sm:$0xff]   ;;  %v3187_v56 = vld [vmem:[%s4484_s3 + $0x1a0] ss:$16 sps:$4 sm:$0xff]  }
 0x14a   :  { %v2923_v61 = vpop.f32.mrb[56].mxu0  ;;  %v1119_v57 = vpack.c.bf16 %v1082_v59, %v1081_v58  ;;  %v3191_v58 = vld [vmem:[%s4484_s3 + $0xcc] ss:$16 sps:$4 sm:$0xff]   ;;  %v3193_v59 = vld [vmem:[%s4484_s3 + $0x1c0] ss:$16 sps:$4 sm:$0xff]  }
 0x14b   :  { %v998_v54 = vpop.f32.mrb[57].mxu0  ;;  %v1007_v23 = vadd.f32 %v2923_v61, %v450_v50  ;;  %2062 = vmatmul.mubr.bf16.gmra.mrb[20].mxu1 %v3146_v52  ;;  %v3182_v50 = vld [vmem:[%s4484_s3 + $0x88] ss:$16 sps:$4 sm:$0xff]   ;;  %v3195_v61 = vld [vmem:[%s4484_s3 + $0x1e4] ss:$16 sps:$4 sm:$0xff]  }
 0x14c   :  { %v999_v2 = vadd.f32 %v998_v54, %v440_v41  ;;  %v2924_v24 = vpop.f32.mrb[58].mxu0  ;;  %2235 = vmatpush1.bf16.msra.mxu0 %v1119_v57  ;;  %2975 = vmatpush1.bf16.msra.mxu1 %v1119_v57  ;;  %v3159_v41 = vld [vmem:[%s4484_s3 + $0x124] ss:$16 sps:$4 sm:$0xff]   ;;  %v3188_v52 = vld [vmem:[%s4484_s3 + $0xa8] ss:$16 sps:$4 sm:$0xff]  }
 0x14d   :  { %v1010_v5 = vadd.f32 %v2924_v24, %v455_v16  ;;  %v1001_v60 = vpop.f32.mrb[59].mxu0  ;;  %2236 = vmatprep.subr.bf16.mxu0 %v3281_v0  ;;  %2960 = vmatprep.subr.bf16.mxu1 %v3281_v0  ;;  %v1087_v55 = vmax.f32 %v1007_v23, 0.0  ;;  %v3189_v16 = vld [vmem:[%s4484_s3 + $0x1c4] ss:$16 sps:$4 sm:$0xff]   ;;  %v3197_v57 = vld [vmem:[%s4484_s3 + $0xec] ss:$16 sps:$4 sm:$0xff]  }
 0x14e   :  { %v1002_v20 = vadd.f32 %v1001_v60, %v445_v45  ;;  %2069 = vmatprep.mubr.bf16.mxu1 %v3147_v4  ;;  %v1085_v31 = vmax.f32 %v999_v2, 0.0  ;;  %v3169_v45 = vld [vmem:[%s4484_s3 + $0x140] ss:$16 sps:$4 sm:$0xff]   ;;  %v3200_v4 = vld [vmem:[%s4484_s3 + $0xe8] ss:$16 sps:$4 sm:$0xff]  }
 0x14f   :  { %v1088_v9 = vmax.f32 %v1010_v5, 0.0  ;;  %v3199_v54 = vld [vmem:[%s4484_s3 + $0x1e0] ss:$16 sps:$4 sm:$0xff]   ;;  %v3201_v23 = vld [vmem:[%s4484_s3 + $0x204] ss:$16 sps:$4 sm:$0xff]  }
 0x150   :  { %v1086_v12 = vmax.f32 %v1002_v20, 0.0  ;;  %2237 = vmatpush1.bf16.msra.mxu0 %v1120_v22  ;;  %2976 = vmatpush1.bf16.msra.mxu1 %v1120_v22  ;;  %v3194_v22 = vld [vmem:[%s4484_s3 + $0xc8] ss:$16 sps:$4 sm:$0xff]   ;;  %v3205_v2 = vld [vmem:[%s4484_s3 + $0x200] ss:$16 sps:$4 sm:$0xff]  }
 0x151   :  { %v1122_v51 = vpack.c.bf16 %v1088_v9, %v1087_v55  ;;  %2238 = vmatprep.subr.bf16.mxu0 %v3281_v0  ;;  %2961 = vmatprep.subr.bf16.mxu1 %v3281_v0  ;;  %v3206_v24 = vld [vmem:[%s4484_s3 + $0x108] ss:$16 sps:$4 sm:$0xff]   ;;  %v3207_v5 = vld [vmem:[%s4484_s3 + $0x224] ss:$16 sps:$4 sm:$0xff]   ;;  %v3209_v60 = vld [vmem:[%s4484_s3 + $0x12c] ss:$16 sps:$4 sm:$0xff]  }
 0x152   :  { %v2927_v15 = vpop.f32.mrb[60].mxu0  ;;  %v1121_v38 = vpack.c.bf16 %v1086_v12, %v1085_v31  ;;  %v3212_v20 = vld [vmem:[%s4484_s3 + $0x128] ss:$16 sps:$4 sm:$0xff]   ;;  %v3213_v55 = vld [vmem:[%s4484_s3 + $0x244] ss:$16 sps:$4 sm:$0xff]  }
 0x153   :  { %v1014_v25 = vpop.f32.mrb[61].mxu0  ;;  %v1023_v33 = vadd.f32 %v2927_v15, %v470_v21  ;;  %2070 = vmatmul.mubr.bf16.gmra.mrb[24].mxu1 %v3149_v7  ;;  %v3215_v9 = vld [vmem:[%s4484_s3 + $0x14c] ss:$16 sps:$4 sm:$0xff]   ;;  %v3217_v7 = vld [vmem:[%s4484_s3 + $0x240] ss:$16 sps:$4 sm:$0xff]  }
 0x154   :  { %v1015_v34 = vadd.f32 %v1014_v25, %v460_v1  ;;  %v2928_v26 = vpop.f32.mrb[62].mxu0  ;;  %2239 = vmatpush1.bf16.msra.mxu0 %v1121_v38  ;;  %2977 = vmatpush1.bf16.msra.mxu1 %v1121_v38  ;;  %v3203_v1 = vld [vmem:[%s4484_s3 + $0x10c] ss:$16 sps:$4 sm:$0xff]   ;;  %v3218_v31 = vld [vmem:[%s4484_s3 + $0x148] ss:$16 sps:$4 sm:$0xff]  }
 0x155   :  { %v1026_v11 = vadd.f32 %v2928_v26, %v475_v3  ;;  %v1017_v27 = vpop.f32.mrb[63].mxu0  ;;  %2240 = vmatprep.subr.bf16.mxu0 %v3281_v0  ;;  %2962 = vmatprep.subr.bf16.mxu1 %v3281_v0  ;;  %v1091_v30 = vmax.f32 %v1023_v33, 0.0  ;;  %v3219_v12 = vld [vmem:[%s4484_s3 + $0x264] ss:$16 sps:$4 sm:$0xff]   ;;  %v3223_v15 = vld [vmem:[%s4484_s3 + $0x260] ss:$16 sps:$4 sm:$0xff]  }
 0x156   :  { %v1018_v28 = vadd.f32 %v1017_v27, %v465_v8  ;;  %2077 = vmatprep.mubr.bf16.mxu1 %v3150_v17  ;;  %v1089_v18 = vmax.f32 %v1015_v34, 0.0  ;;  %v3211_v8 = vld [vmem:[%s4484_s3 + $0x220] ss:$16 sps:$4 sm:$0xff]   ;;  %v3224_v21 = vld [vmem:[%s4484_s3 + $0x168] ss:$16 sps:$4 sm:$0xff]  }
 0x157   :  { %v1092_v49 = vmax.f32 %v1026_v11, 0.0  ;;  %v3225_v38 = vld [vmem:[%s4484_s3 + $0x284] ss:$16 sps:$4 sm:$0xff]   ;;  %v3227_v25 = vld [vmem:[%s4484_s3 + $0x18c] ss:$16 sps:$4 sm:$0xff]  }
 0x158   :  { %v1090_v29 = vmax.f32 %v1018_v28, 0.0  ;;  %2241 = vmatpush1.bf16.msra.mxu0 %v1122_v51  ;;  %2978 = vmatpush1.bf16.msra.mxu1 %v1122_v51  ;;  %v3221_v51 = vld [vmem:[%s4484_s3 + $0x16c] ss:$16 sps:$4 sm:$0xff]   ;;  %v3229_v17 = vld [vmem:[%s4484_s3 + $0x280] ss:$16 sps:$4 sm:$0xff]  }
 0x159   :  { %v1124_v63 = vpack.c.bf16 %v1092_v49, %v1091_v30  ;;  %2242 = vmatprep.subr.bf16.mxu0 %v3281_v0  ;;  %2963 = vmatprep.subr.bf16.mxu1 %v3281_v0  ;;  %v3230_v33 = vld [vmem:[%s4484_s3 + $0x188] ss:$16 sps:$4 sm:$0xff]   ;;  %v3231_v3 = vld [vmem:[%s4484_s3 + $0x2a4] ss:$16 sps:$4 sm:$0xff]   ;;  %v3233_v34 = vld [vmem:[%s4484_s3 + $0x1ac] ss:$16 sps:$4 sm:$0xff]  }
 0x15a   :  { %v1123_v19 = vpack.c.bf16 %v1090_v29, %v1089_v18  ;;  %v3235_v26 = vld [vmem:[%s4484_s3 + $0x2a0] ss:$16 sps:$4 sm:$0xff]   ;;  %v3236_v11 = vld [vmem:[%s4484_s3 + $0x1a8] ss:$16 sps:$4 sm:$0xff]   ;;  %v3237_v27 = vld [vmem:[%s4484_s3 + $0x2c4] ss:$16 sps:$4 sm:$0xff]  }
 0x15b   :  { %2078 = vmatmul.mubr.bf16.gmra.mrb[28].mxu1 %v3152_v6  ;;  %v3239_v28 = vld [vmem:[%s4484_s3 + $0x1cc] ss:$16 sps:$4 sm:$0xff]   ;;  %v3241_v30 = vld [vmem:[%s4484_s3 + $0x2c0] ss:$16 sps:$4 sm:$0xff]   ;;  %v3242_v49 = vld [vmem:[%s4484_s3 + $0x1c8] ss:$16 sps:$4 sm:$0xff]  }
 0x15c   :  { %2243 = vmatpush1.bf16.msra.mxu0 %v1123_v19  ;;  %2979 = vmatpush1.bf16.msra.mxu1 %v1123_v19  ;;  %v3243_v6 = vld [vmem:[%s4484_s3 + $0x2e4] ss:$16 sps:$4 sm:$0xff]   ;;  %v3245_v18 = vld [vmem:[%s4484_s3 + $0x1ec] ss:$16 sps:$4 sm:$0xff]   ;;  %v3247_v29 = vld [vmem:[%s4484_s3 + $0x2e0] ss:$16 sps:$4 sm:$0xff]  }
 0x15d   :  { %2244 = vmatprep.subr.bf16.mxu0 %v3281_v0  ;;  %2964 = vmatprep.subr.bf16.mxu1 %v3281_v0  ;;  %v3163_v0 = vld [vmem:[%s4484_s3 + $0x120] ss:$16 sps:$4 sm:$0xff]   ;;  %v3249_v19 = vld [vmem:[%s4484_s3 + $0x20c] ss:$16 sps:$4 sm:$0xff]  }
 0x15e   :  { %2085 = vmatprep.mubr.bf16.mxu1 %v3153_v35  ;;  %v3253_v35 = vld [vmem:[%s4484_s3 + $0x22c] ss:$16 sps:$4 sm:$0xff]  }
 0x160   :  { %2245 = vmatpush1.bf16.msra.mxu0 %v1124_v63  ;;  %2980 = vmatpush1.bf16.msra.mxu1 %v1124_v63  ;;  %v3248_v63 = vld [vmem:[%s4484_s3 + $0x1e8] ss:$16 sps:$4 sm:$0xff]  }
 0x163   :  { %2086 = vmatmul.mubr.bf16.gmra.mrb[32].mxu1 %v3158_v39  ;;  %2247 = vmatmul.mubr.bf16.vlgmr.msra.gmra.mrb[64].mxu0 %v3155_v36  ;;  %v3251_v36 = vld [vmem:[%s4484_s3 + $0x228] ss:$16 sps:$4 sm:$0xff]  }
 0x164   :  { %2093 = vmatprep.mubr.bf16.mxu1 %v3159_v41  ;;  %2254 = vmatprep.mubr.bf16.mxu0 %v3161_v44  ;;  %v3254_v39 = vld [vmem:[%s4484_s3 + $0x208] ss:$16 sps:$4 sm:$0xff]   ;;  %v3255_v41 = vld [vmem:[%s4484_s3 + $0x24c] ss:$16 sps:$4 sm:$0xff]  }
 0x165   :  { %v3257_v44 = vld [vmem:[%s4484_s3 + $0x248] ss:$16 sps:$4 sm:$0xff]  }
 0x16b   :  { %2094 = vmatmul.mubr.bf16.gmra.mrb[36].mxu1 %v3163_v0  ;;  %2255 = vmatmul.mubr.bf16.gmra.mrb[68].mxu0 %v3164_v42  ;;  %v3258_v0 = vld [vmem:[%s4484_s3 + $0x26c] ss:$16 sps:$4 sm:$0xff]   ;;  %v3260_v42 = vld [vmem:[%s4484_s3 + $0x268] ss:$16 sps:$4 sm:$0xff]  }
 0x16c   :  { %2101 = vmatprep.mubr.bf16.mxu1 %v3165_v43  ;;  %2262 = vmatprep.mubr.bf16.mxu0 %v3167_v47  ;;  %v3261_v43 = vld [vmem:[%s4484_s3 + $0x28c] ss:$16 sps:$4 sm:$0xff]  }
 0x173   :  { %2102 = vmatmul.mubr.bf16.gmra.mrb[40].mxu1 %v3169_v45  ;;  %2263 = vmatmul.mubr.bf16.gmra.mrb[72].mxu0 %v3170_v37  ;;  %v3263_v37 = vld [vmem:[%s4484_s3 + $0x288] ss:$16 sps:$4 sm:$0xff]  }
 0x174   :  { %2109 = vmatprep.mubr.bf16.mxu1 %v3171_v62  ;;  %2270 = vmatprep.mubr.bf16.mxu0 %v3173_v46  ;;  %v3264_v46 = vld [vmem:[%s4484_s3 + $0x2ac] ss:$16 sps:$4 sm:$0xff]  }
 0x17b   :  { %2110 = vmatmul.mubr.bf16.gmra.mrb[44].mxu1 %v3175_v40  ;;  %2271 = vmatmul.mubr.bf16.gmra.mrb[76].mxu0 %v3176_v13 }
 0x17c   :  { %2117 = vmatprep.mubr.bf16.mxu1 %v3177_v48  ;;  %2278 = vmatprep.mubr.bf16.mxu0 %v3179_v32  ;;  %v3266_v32 = vld [vmem:[%s4484_s3 + $0x2a8] ss:$16 sps:$4 sm:$0xff]  }
 0x183   :  { %2118 = vmatmul.mubr.bf16.gmra.mrb[48].mxu1 %v3181_v14  ;;  %2279 = vmatmul.mubr.bf16.gmra.mrb[80].mxu0 %v3182_v50  ;;  %v3267_v50 = vld [vmem:[%s4484_s3 + $0x2cc] ss:$16 sps:$4 sm:$0xff]  }
 0x184   :  { %2125 = vmatprep.mubr.bf16.mxu1 %v3183_v53  ;;  %2286 = vmatprep.mubr.bf16.mxu0 %v3185_v10  ;;  %v4278_v10 = vpop.permute.xlu1 %1356 }
 0x18b   :  { %2126 = vmatmul.mubr.bf16.gmra.mrb[52].mxu1 %v3187_v56  ;;  %2287 = vmatmul.mubr.bf16.gmra.mrb[84].mxu0 %v3188_v52  ;;  %v4280_v56 = vpop.permute.xlu0 %1351 }
 0x18c   :  { %2133 = vmatprep.mubr.bf16.mxu1 %v3189_v16  ;;  %2294 = vmatprep.mubr.bf16.mxu0 %v3191_v58  ;;  %v3269_v58 = vld [vmem:[%s4484_s3 + $0x2c8] ss:$16 sps:$4 sm:$0xff]  }
 0x193   :  { %2134 = vmatmul.mubr.bf16.gmra.mrb[56].mxu1 %v3193_v59  ;;  %2295 = vmatmul.mubr.bf16.gmra.mrb[88].mxu0 %v3194_v22  ;;  %v3270_v22 = vld [vmem:[%s4484_s3 + $0x2ec] ss:$16 sps:$4 sm:$0xff]  }
 0x194   :  { %2141 = vmatprep.mubr.bf16.mxu1 %v3195_v61  ;;  %2302 = vmatprep.mubr.bf16.mxu0 %v3197_v57  ;;  %v1277_v57 = vpop.permute.xlu1 %1276 }
 0x19b   :  { %2142 = vmatmul.mubr.bf16.gmra.mrb[60].mxu1 %v3199_v54  ;;  %2303 = vmatmul.mubr.bf16.gmra.mrb[92].mxu0 %v3200_v4  ;;  %v1272_v54 = vpop.permute.xlu0 %1271 }
 0x19c   :  { %2149 = vmatprep.mubr.bf16.mxu1 %v3201_v23  ;;  %2310 = vmatprep.mubr.bf16.mxu0 %v3203_v1  ;;  %v3272_v1 = vld [vmem:[%s4484_s3 + $0x2e8] ss:$16 sps:$4 sm:$0xff]  }
 0x1a3   :  { %2150 = vmatmul.mubr.bf16.gmra.mrb[64].mxu1 %v3205_v2  ;;  %2311 = vmatmul.mubr.bf16.gmra.mrb[96].mxu0 %v3206_v24  ;;  %v4297_v2 = vpop.permute.xlu1 %1366 }
 0x1a4   :  { %2157 = vmatprep.mubr.bf16.mxu1 %v3207_v5  ;;  %2318 = vmatprep.mubr.bf16.mxu0 %v3209_v60  ;;  %v4301_v5 = vpop.permute.xlu0 %1361 }
 0x1ab   :  { %2158 = vmatmul.mubr.bf16.gmra.mrb[68].mxu1 %v3211_v8  ;;  %2319 = vmatmul.mubr.bf16.gmra.mrb[100].mxu0 %v3212_v20  ;;  %v1287_v8 = vpop.permute.xlu1 %1286 }
 0x1ac   :  { %2165 = vmatprep.mubr.bf16.mxu1 %v3213_v55  ;;  %2326 = vmatprep.mubr.bf16.mxu0 %v3215_v9  ;;  %v1282_v55 = vpop.permute.xlu0 %1281 }
 0x1b3   :  { %2166 = vmatmul.mubr.bf16.gmra.mrb[72].mxu1 %v3217_v7  ;;  %2327 = vmatmul.mubr.bf16.gmra.mrb[104].mxu0 %v3218_v31 }
 0x1b4   :  { %2173 = vmatprep.mubr.bf16.mxu1 %v3219_v12  ;;  %2334 = vmatprep.mubr.bf16.mxu0 %v3221_v51  ;;  %v4307_v12 = vpop.permute.xlu1 %1376  ;;  %v4309_v51 = vpop.permute.xlu0 %1371 }
 0x1bb   :  { %2174 = vmatmul.mubr.bf16.gmra.mrb[76].mxu1 %v3223_v15  ;;  %2335 = vmatmul.mubr.bf16.gmra.mrb[108].mxu0 %v3224_v21 }
 0x1bc   :  { %2181 = vmatprep.mubr.bf16.mxu1 %v3225_v38  ;;  %2342 = vmatprep.mubr.bf16.mxu0 %v3227_v25 }
 0x1c3   :  { %2182 = vmatmul.mubr.bf16.gmra.mrb[80].mxu1 %v3229_v17  ;;  %2343 = vmatmul.mubr.bf16.gmra.mrb[112].mxu0 %v3230_v33  ;;  %v1297_v17 = vpop.permute.xlu1 %1296  ;;  %v1292_v33 = vpop.permute.xlu0 %1291 }
 0x1c4   :  { %2189 = vmatprep.mubr.bf16.mxu1 %v3231_v3  ;;  %2350 = vmatprep.mubr.bf16.mxu0 %v3233_v34 }
 0x1cb   :  { %2190 = vmatmul.mubr.bf16.gmra.mrb[84].mxu1 %v3235_v26  ;;  %2351 = vmatmul.mubr.bf16.gmra.mrb[116].mxu0 %v3236_v11  ;;  %v4317_v26 = vpop.permute.xlu1 %1386 }
 0x1cc   :  { %2197 = vmatprep.mubr.bf16.mxu1 %v3237_v27  ;;  %2358 = vmatprep.mubr.bf16.mxu0 %v3239_v28  ;;  %v4321_v27 = vpop.permute.xlu0 %1381 }
 0x1d3   :  { %2198 = vmatmul.mubr.bf16.gmra.mrb[88].mxu1 %v3241_v30  ;;  %2359 = vmatmul.mubr.bf16.gmra.mrb[120].mxu0 %v3242_v49  ;;  %v4323_v30 = vpop.permute.xlu1 %1306 }
 0x1d4   :  { %2205 = vmatprep.mubr.bf16.mxu1 %v3243_v6  ;;  %2366 = vmatprep.mubr.bf16.mxu0 %v3245_v18  ;;  %v1302_v6 = vpop.permute.xlu0 %1301 }
 0x1db   :  { %2206 = vmatmul.mubr.bf16.gmra.mrb[92].mxu1 %v3247_v29  ;;  %2367 = vmatmul.mubr.bf16.gmra.mrb[124].mxu0 %v3248_v63 }
 0x1dc   :  { %2374 = vmatprep.mubr.bf16.mxu0 %v3249_v19  ;;  %2382 = vmatprep.mubr.bf16.mxu1 %v3253_v35  ;;  %v4329_v19 = vpop.permute.xlu1 %1396  ;;  %v4331_v35 = vpop.permute.xlu0 %1391 }
 0x1e3   :  { %2375 = vmatmul.mubr.bf16.gmra.mrb[128].mxu0 %v3254_v39  ;;  %2383 = vmatmul.mubr.bf16.vlgmr.msra.gmra.mrb[68].mxu1 %v3251_v36 }
 0x1e4   :  { %2390 = vmatprep.mubr.bf16.mxu1 %v3255_v41 }
 0x1eb   :  { %2391 = vmatmul.mubr.bf16.gmra.mrb[72].mxu1 %v3257_v44 }
 0x1ec   :  { %2398 = vmatprep.mubr.bf16.mxu1 %v3258_v0 }
 0x1f3   :  { %2399 = vmatmul.mubr.bf16.gmra.mrb[76].mxu1 %v3260_v42 }
 0x1f4   :  { %2406 = vmatprep.mubr.bf16.mxu1 %v3261_v43 }
 0x1f6   :  { %v4258_v47 = vpop.f32.mrb[0].mxu1 }
 0x1f7   :  { %v2025_v45 = vpop.f32.mrb[1].mxu1  ;;  %v2024_v36 = vadd.f32 %v4258_v47, %v1272_v54 }
 0x1f8   :  { %v4263_v62 = vpop.f32.mrb[2].mxu1 }
 0x1f9   :  { %v2028_v40 = vpop.f32.mrb[3].mxu1  ;;  %v2027_v44 = vadd.f32 %v4263_v62, %v1277_v57 }
 0x1fb   :  { %2407 = vmatmul.mubr.bf16.gmra.mrb[80].mxu1 %v3263_v37 }
 0x1fc   :  { %2414 = vmatprep.mubr.bf16.mxu1 %v3264_v46  ;;  %v3275_v46 = vld [vmem:[%s4486_s5 + $0x4] ss:$12 sps:$4 sm:$0xff]  }
 0x1fd   :  { %2575 = vmatprep.mubr.bf16.mxu0 %v3275_v46 }
 0x1fe   :  { %v4268_v13 = vpop.f32.mrb[4].mxu1 }
 0x1ff   :  { %v2033_v48 = vpop.f32.mrb[5].mxu1  ;;  %v2032_v62 = vadd.f32 %v4268_v13, %v1282_v55 }
 0x200   :  { %v4273_v14 = vpop.f32.mrb[6].mxu1 }
 0x201   :  { %v2036_v53 = vpop.f32.mrb[7].mxu1  ;;  %v2035_v57 = vadd.f32 %v4273_v14, %v1287_v8 }
 0x202   :  { %v1317_v53 = vpop.permute.xlu1 %1316 }
 0x203   :  { %2415 = vmatmul.mubr.bf16.gmra.mrb[84].mxu1 %v3266_v32 }
 0x204   :  { %2422 = vmatprep.mubr.bf16.mxu1 %v3267_v50 }
 0x206   :  { %v4282_v52 = vpop.f32.mrb[8].mxu1 }
 0x207   :  { %v2041_v16 = vpop.f32.mrb[9].mxu1  ;;  %v2040_v55 = vadd.f32 %v4282_v52, %v1292_v33 }
 0x208   :  { %v4287_v59 = vpop.f32.mrb[10].mxu1  ;;  %v1312_v16 = vpop.permute.xlu0 %1311 }
 0x209   :  { %v2044_v61 = vpop.f32.mrb[11].mxu1 }
 0x20b   :  { %2423 = vmatmul.mubr.bf16.gmra.mrb[88].mxu1 %v3269_v58 }
 0x20c   :  { %2430 = vmatprep.mubr.bf16.mxu1 %v3270_v22  ;;  %v4352_v13 = vpop.permute.xlu0 %1401 }
 0x20e   :  { %v4292_v4 = vpop.f32.mrb[12].mxu1 }
 0x20f   :  { %v2049_v23 = vpop.f32.mrb[13].mxu1  ;;  %v2048_v33 = vadd.f32 %v4292_v4, %v1302_v6 }
 0x210   :  { %v4299_v24 = vpop.f32.mrb[14].mxu1  ;;  %v1322_v52 = vpop.permute.xlu0 %1321 }
 0x211   :  { %v2052_v60 = vpop.f32.mrb[15].mxu1 }
 0x213   :  { %2431 = vmatmul.mubr.bf16.gmra.mrb[92].mxu1 %v3272_v1 }
 0x214   :  { %v4373_v6 = vpop.permute.xlu0 %1411 }
 0x216   :  { %v4303_v20 = vpop.f32.mrb[16].mxu1 }
 0x217   :  { %v2057_v9 = vpop.f32.mrb[17].mxu1 }
 0x218   :  { %v4305_v7 = vpop.f32.mrb[18].mxu1 }
 0x219   :  { %v2060_v31 = vpop.f32.mrb[19].mxu1 }
 0x21e   :  { %v4311_v15 = vpop.f32.mrb[20].mxu1 }
 0x21f   :  { %v2065_v21 = vpop.f32.mrb[21].mxu1 }
 0x220   :  { %v4313_v38 = vpop.f32.mrb[22].mxu1 }
 0x221   :  { %v2068_v25 = vpop.f32.mrb[23].mxu1 }
 0x226   :  { %v4315_v3 = vpop.f32.mrb[24].mxu1 }
 0x227   :  { %v2073_v34 = vpop.f32.mrb[25].mxu1 }
 0x228   :  { %v4319_v11 = vpop.f32.mrb[26].mxu1 }
 0x229   :  { %v2076_v28 = vpop.f32.mrb[27].mxu1 }
 0x22e   :  { %v4325_v49 = vpop.f32.mrb[28].mxu1 }
 0x22f   :  { %v2081_v18 = vpop.f32.mrb[29].mxu1 }
 0x230   :  { %v4327_v29 = vpop.f32.mrb[30].mxu1  ;;  %v4350_v18 = vpop.permute.xlu1 %1406 }
 0x231   :  { %v2084_v63 = vpop.f32.mrb[31].mxu1 }
 0x236   :  { %v4334_v39 = vpop.f32.mrb[32].mxu1  ;;  %v2248_v41 = vpop.f32.mrb[64].mxu0 }
 0x237   :  { %v2249_v0 = vadd.f32 %v2248_v41, %v2024_v36  ;;  %v2089_v42 = vpop.f32.mrb[33].mxu1  ;;  %v2250_v43 = vpop.f32.mrb[65].mxu0  ;;  %v2043_v36 = vadd.f32 %v4287_v59, %v1297_v17  ;;  %v2051_v17 = vadd.f32 %v4299_v24, %v4323_v30 }
 0x238   :  { %v4337_v45 = vpop.f32.mrb[34].mxu1  ;;  %v2251_v37 = vpop.f32.mrb[66].mxu0 }
 0x239   :  { %v2252_v40 = vadd.f32 %v2251_v37, %v2027_v44  ;;  %v2253_v48 = vpop.f32.mrb[67].mxu0  ;;  %v2092_v32 = vpop.f32.mrb[35].mxu1  ;;  %v2439_v47 = vmax.f32 %v2249_v0, 0.0 }
 0x23b   :  { %v2440_v50 = vmax.f32 %v2252_v40, 0.0 }
 0x23d   :  { %v4343_v58 = vpack.c.bf16 %v2440_v50, %v2439_v47  ;;  %v1327_v47 = vpop.permute.xlu1 %1326 }
 0x23e   :  { %v4345_v22 = vpop.f32.mrb[36].mxu1  ;;  %v2256_v61 = vpop.f32.mrb[68].mxu0 }
 0x23f   :  { %v2257_v54 = vadd.f32 %v2256_v61, %v2032_v62  ;;  %v2097_v23 = vpop.f32.mrb[37].mxu1  ;;  %v2258_v1 = vpop.f32.mrb[69].mxu0 }
 0x240   :  { %v4348_v60 = vpop.f32.mrb[38].mxu1  ;;  %v2259_v9 = vpop.f32.mrb[70].mxu0 }
 0x241   :  { %v2260_v31 = vadd.f32 %v2259_v9, %v2035_v57  ;;  %v2261_v21 = vpop.f32.mrb[71].mxu0  ;;  %v2100_v25 = vpop.f32.mrb[39].mxu1  ;;  %v2441_v34 = vmax.f32 %v2257_v54, 0.0 }
 0x242   :  { %v4371_v4 = vpop.permute.xlu1 %1416 }
 0x243   :  { %v2442_v28 = vmax.f32 %v2260_v31, 0.0 }
 0x245   :  { %v4355_v63 = vpack.c.bf16 %v2442_v28, %v2441_v34  ;;  %v2056_v28 = vadd.f32 %v4303_v20, %v1312_v16  ;;  %v1332_v20 = vpop.permute.xlu0 %1331  ;;  %v2064_v16 = vadd.f32 %v4311_v15, %v1322_v52 }
 0x246   :  { %v4357_v14 = vpop.f32.mrb[40].mxu1  ;;  %v2264_v8 = vpop.f32.mrb[72].mxu0  ;;  %v2072_v52 = vadd.f32 %v4315_v3, %v1332_v20 }
 0x247   :  { %v2265_v41 = vadd.f32 %v2264_v8, %v2040_v55  ;;  %v2105_v44 = vpop.f32.mrb[41].mxu1  ;;  %v2266_v0 = vpop.f32.mrb[73].mxu0  ;;  %v2059_v8 = vadd.f32 %v4305_v7, %v1317_v53  ;;  %v2067_v53 = vadd.f32 %v4313_v38, %v1327_v47 }
 0x248   :  { %v4360_v42 = vpop.f32.mrb[42].mxu1  ;;  %v2267_v43 = vpop.f32.mrb[74].mxu0 }
 0x249   :  { %v2268_v37 = vadd.f32 %v2267_v43, %v2043_v36  ;;  %v2269_v46 = vpop.f32.mrb[75].mxu0  ;;  %v2108_v40 = vpop.f32.mrb[43].mxu1  ;;  %v2443_v48 = vmax.f32 %v2265_v41, 0.0 }
 0x24a   :  { %v4393_v15 = vpop.permute.xlu0 %1421 }
 0x24b   :  { %v2444_v32 = vmax.f32 %v2268_v37, 0.0 }
 0x24d   :  { %v4363_v50 = vpack.c.bf16 %v2444_v32, %v2443_v48 }
 0x24e   :  { %v4365_v62 = vpop.f32.mrb[44].mxu1  ;;  %v2272_v59 = vpop.f32.mrb[76].mxu0 }
 0x24f   :  { %v2273_v61 = vadd.f32 %v2272_v59, %v2048_v33  ;;  %v2113_v57 = vpop.f32.mrb[45].mxu1  ;;  %v2274_v54 = vpop.f32.mrb[77].mxu0 }
 0x250   :  { %v4369_v23 = vpop.f32.mrb[46].mxu1  ;;  %v2275_v1 = vpop.f32.mrb[78].mxu0 }
 0x251   :  { %v2276_v9 = vadd.f32 %v2275_v1, %v2051_v17  ;;  %v2277_v31 = vpop.f32.mrb[79].mxu0  ;;  %v2116_v21 = vpop.f32.mrb[47].mxu1  ;;  %v2445_v25 = vmax.f32 %v2273_v61, 0.0 }
 0x252   :  { %v1337_v33 = vpop.permute.xlu1 %1336 }
 0x253   :  { %v2446_v34 = vmax.f32 %v2276_v9, 0.0 }
 0x255   :  { %v4376_v55 = vpack.c.bf16 %v2446_v34, %v2445_v25 }
 0x256   :  { %v4378_v24 = vpop.f32.mrb[48].mxu1  ;;  %v2280_v30 = vpop.f32.mrb[80].mxu0 }
 0x257   :  { %v2281_v36 = vadd.f32 %v2280_v30, %v2056_v28  ;;  %v2121_v41 = vpop.f32.mrb[49].mxu1  ;;  %v2282_v44 = vpop.f32.mrb[81].mxu0 }
 0x258   :  { %v4381_v0 = vpop.f32.mrb[50].mxu1  ;;  %v2283_v43 = vpop.f32.mrb[82].mxu0 }
 0x259   :  { %v2284_v37 = vadd.f32 %v2283_v43, %v2059_v8  ;;  %v2285_v46 = vpop.f32.mrb[83].mxu0  ;;  %v2124_v40 = vpop.f32.mrb[51].mxu1  ;;  %v2447_v48 = vmax.f32 %v2281_v36, 0.0  ;;  %v2075_v36 = vadd.f32 %v4319_v11, %v1337_v33 }
 0x25a   :  { %v4391_v30 = vpop.permute.xlu1 %1426 }
 0x25b   :  { %v2448_v32 = vmax.f32 %v2284_v37, 0.0 }
 0x25d   :  { %v4384_v59 = vpack.c.bf16 %v2448_v32, %v2447_v48 }
 0x25e   :  { %v4386_v17 = vpop.f32.mrb[52].mxu1  ;;  %v2288_v7 = vpop.f32.mrb[84].mxu0 }
 0x25f   :  { %v2289_v61 = vadd.f32 %v2288_v7, %v2064_v16  ;;  %v2129_v57 = vpop.f32.mrb[53].mxu1  ;;  %v2290_v54 = vpop.f32.mrb[85].mxu0 }
 0x260   :  { %v4389_v1 = vpop.f32.mrb[54].mxu1  ;;  %v2291_v9 = vpop.f32.mrb[86].mxu0 }
 0x261   :  { %v2292_v31 = vadd.f32 %v2291_v9, %v2067_v53  ;;  %v2293_v21 = vpop.f32.mrb[87].mxu0  ;;  %v2132_v25 = vpop.f32.mrb[55].mxu1  ;;  %v2449_v34 = vmax.f32 %v2289_v61, 0.0 }
 0x262   :  { %v1342_v53 = vpop.permute.xlu0 %1341  ;;  %v1347_v3 = vpop.permute.xlu1 %1346 }
 0x263   :  { %v2450_v28 = vmax.f32 %v2292_v31, 0.0  ;;  %v2080_v20 = vadd.f32 %v4325_v49, %v1342_v53  ;;  %v2083_v33 = vadd.f32 %v4327_v29, %v1347_v3  ;;  %v2088_v49 = vadd.f32 %v4334_v39, %v4280_v56 }
 0x264   :  { %v2091_v29 = vadd.f32 %v4337_v45, %v4278_v10  ;;  %v2096_v56 = vadd.f32 %v4345_v22, %v4301_v5  ;;  %v2107_v22 = vadd.f32 %v4360_v42, %v4307_v12 }
 0x265   :  { %v4396_v8 = vpack.c.bf16 %v2450_v28, %v2449_v34 }
 0x266   :  { %v4398_v38 = vpop.f32.mrb[56].mxu1  ;;  %v2296_v47 = vpop.f32.mrb[88].mxu0 }
 0x267   :  { %v2297_v41 = vadd.f32 %v2296_v47, %v2072_v52  ;;  %v2137_v44 = vpop.f32.mrb[57].mxu1  ;;  %v2298_v43 = vpop.f32.mrb[89].mxu0 }
 0x268   :  { %v4401_v37 = vpop.f32.mrb[58].mxu1  ;;  %v2299_v46 = vpop.f32.mrb[90].mxu0 }
 0x269   :  { %v2300_v40 = vadd.f32 %v2299_v46, %v2075_v36  ;;  %v2301_v48 = vpop.f32.mrb[91].mxu0  ;;  %v2140_v32 = vpop.f32.mrb[59].mxu1  ;;  %v2451_v16 = vmax.f32 %v2297_v41, 0.0 }
 0x26b   :  { %v2452_v7 = vmax.f32 %v2300_v40, 0.0 }
 0x26d   :  { %v4404_v61 = vpack.c.bf16 %v2452_v7, %v2451_v16 }
 0x26e   :  { %v4406_v57 = vpop.f32.mrb[60].mxu1  ;;  %v2304_v11 = vpop.f32.mrb[92].mxu0 }
 0x26f   :  { %v2305_v54 = vadd.f32 %v2304_v11, %v2080_v20  ;;  %v2145_v9 = vpop.f32.mrb[61].mxu1  ;;  %v2306_v31 = vpop.f32.mrb[93].mxu0 }
 0x270   :  { %v4409_v21 = vpop.f32.mrb[62].mxu1  ;;  %v2307_v25 = vpop.f32.mrb[94].mxu0 }
 0x271   :  { %v2308_v34 = vadd.f32 %v2307_v25, %v2083_v33  ;;  %v2309_v28 = vpop.f32.mrb[95].mxu0  ;;  %v2148_v52 = vpop.f32.mrb[63].mxu1  ;;  %v2453_v47 = vmax.f32 %v2305_v54, 0.0  ;;  %v2099_v54 = vadd.f32 %v4348_v60, %v4297_v2 }
 0x272   :  { %v2104_v52 = vadd.f32 %v4357_v14, %v4309_v51  ;;  %v2115_v14 = vadd.f32 %v4369_v23, %v4317_v26 }
 0x273   :  { %v2454_v36 = vmax.f32 %v2308_v34, 0.0 }
 0x275   :  { %v4413_v41 = vpack.c.bf16 %v2454_v36, %v2453_v47 }
 0x276   :  { %v4415_v44 = vpop.f32.mrb[64].mxu1  ;;  %v2312_v43 = vpop.f32.mrb[96].mxu0 }
 0x277   :  { %v2313_v46 = vadd.f32 %v2312_v43, %v2088_v49  ;;  %v2153_v40 = vpop.f32.mrb[65].mxu1  ;;  %v2314_v48 = vpop.f32.mrb[97].mxu0 }
 0x278   :  { %v4419_v32 = vpop.f32.mrb[66].mxu1  ;;  %v2315_v16 = vpop.f32.mrb[98].mxu0 }
 0x279   :  { %v2316_v7 = vadd.f32 %v2315_v16, %v2091_v29  ;;  %v2317_v53 = vpop.f32.mrb[99].mxu0  ;;  %v2156_v3 = vpop.f32.mrb[67].mxu1  ;;  %v2455_v20 = vmax.f32 %v2313_v46, 0.0  ;;  %v2112_v46 = vadd.f32 %v4365_v62, %v4321_v27  ;;  %v2123_v62 = vadd.f32 %v4381_v0, %v4329_v19 }
 0x27a   :  { %v2120_v3 = vadd.f32 %v4378_v24, %v4331_v35  ;;  %v2131_v24 = vadd.f32 %v4389_v1, %v4350_v18 }
 0x27b   :  { %v2456_v11 = vmax.f32 %v2316_v7, 0.0 }
 0x27d   :  { %v2495_v39 = vpack.c.bf16 %v2456_v11, %v2455_v20 }
 0x27e   :  { %v2320_v33 = vpop.f32.mrb[100].mxu0 }
 0x27f   :  { %v2321_v10 = vadd.f32 %v2320_v33, %v2096_v56  ;;  %v2322_v45 = vpop.f32.mrb[101].mxu0  ;;  %2832 = vmatprep.subr.bf16.mxu0 %v2495_v39 }
 0x280   :  { %v2323_v9 = vpop.f32.mrb[102].mxu0  ;;  %2833 = vmatpush3.bf16.msra.mxu0 %v4343_v58 }
 0x281   :  { %v2324_v31 = vadd.f32 %v2323_v9, %v2099_v54  ;;  %v2325_v25 = vpop.f32.mrb[103].mxu0  ;;  %v2457_v34 = vmax.f32 %v2321_v10, 0.0  ;;  %v2128_v54 = vadd.f32 %v4386_v17, %v4352_v13  ;;  %v2139_v17 = vadd.f32 %v4401_v37, %v4371_v4 }
 0x282   :  { %v2147_v4 = vadd.f32 %v4409_v21, %v4391_v30 }
 0x283   :  { %v2458_v28 = vmax.f32 %v2324_v31, 0.0 }
 0x285   :  { %v2496_v47 = vpack.c.bf16 %v2458_v28, %v2457_v34  ;;  %v2136_v34 = vadd.f32 %v4398_v38, %v4373_v6  ;;  %v1437_v6 = vpop.permute.xlu1 %1436 }
 0x286   :  { %v2328_v5 = vpop.f32.mrb[104].mxu0 }
 0x287   :  { %v2329_v36 = vadd.f32 %v2328_v5, %v2104_v52  ;;  %v2330_v2 = vpop.f32.mrb[105].mxu0  ;;  %2834 = vmatprep.subr.bf16.mxu0 %v2496_v47 }
 0x288   :  { %v2331_v60 = vpop.f32.mrb[106].mxu0  ;;  %2835 = vmatpush3.bf16.msra.mxu0 %v4355_v63 }
 0x289   :  { %v2332_v49 = vadd.f32 %v2331_v60, %v2107_v22  ;;  %v2333_v58 = vpop.f32.mrb[107].mxu0  ;;  %v2459_v43 = vmax.f32 %v2329_v36, 0.0  ;;  %v2144_v36 = vadd.f32 %v4406_v57, %v4393_v15  ;;  %v1432_v60 = vpop.permute.xlu0 %1431 }
 0x28a   :  { %v2152_v15 = vadd.f32 %v4415_v44, %v1432_v60 }
 0x28b   :  { %v2460_v29 = vmax.f32 %v2332_v49, 0.0 }
 0x28d   :  { %v2497_v40 = vpack.c.bf16 %v2460_v29, %v2459_v43 }
 0x28e   :  { %v2336_v51 = vpop.f32.mrb[108].mxu0 }
 0x28f   :  { %v2337_v48 = vadd.f32 %v2336_v51, %v2112_v46  ;;  %v2338_v12 = vpop.f32.mrb[109].mxu0  ;;  %2836 = vmatprep.subr.bf16.mxu0 %v2497_v40  ;;  %v1447_v40 = vpop.permute.xlu1 %1446 }
 0x290   :  { %v2339_v42 = vpop.f32.mrb[110].mxu0  ;;  %2837 = vmatpush3.bf16.msra.mxu0 %v4363_v50  ;;  %v1442_v51 = vpop.permute.xlu0 %1441  ;;  %v2155_v12 = vadd.f32 %v4419_v32, %v1437_v6 }
 0x291   :  { %v2340_v16 = vadd.f32 %v2339_v42, %v2115_v14  ;;  %v2341_v63 = vpop.f32.mrb[111].mxu0  ;;  %v2461_v7 = vmax.f32 %v2337_v48, 0.0 }
 0x293   :  { %v2462_v53 = vmax.f32 %v2340_v16, 0.0 }
 0x295   :  { %v2498_v20 = vpack.c.bf16 %v2462_v53, %v2461_v7 }
 0x296   :  { %v2344_v27 = vpop.f32.mrb[112].mxu0 }
 0x297   :  { %v2345_v11 = vadd.f32 %v2344_v27, %v2120_v3  ;;  %v2346_v26 = vpop.f32.mrb[113].mxu0  ;;  %2838 = vmatprep.subr.bf16.mxu0 %v2498_v20  ;;  %v3282_v20 = vmov 0.0  }
 0x298   :  { %v2347_v23 = vpop.f32.mrb[114].mxu0  ;;  %2839 = vmatpush3.bf16.msra.mxu0 %v4376_v55 }
 0x299   :  { %v2348_v56 = vadd.f32 %v2347_v23, %v2123_v62  ;;  %v2349_v50 = vpop.f32.mrb[115].mxu0  ;;  %v2463_v39 = vmax.f32 %v2345_v11, 0.0 }
 0x29a   :  { %v1452_v50 = vpop.permute.xlu0 %1451 }
 0x29b   :  { %v2464_v33 = vmax.f32 %v2348_v56, 0.0 }
 0x29d   :  { %v2499_v10 = vpack.c.bf16 %v2464_v33, %v2463_v39 }
 0x29e   :  { %v2352_v35 = vpop.f32.mrb[116].mxu0 }
 0x29f   :  { %v2353_v45 = vadd.f32 %v2352_v35, %v2128_v54  ;;  %v2354_v19 = vpop.f32.mrb[117].mxu0  ;;  %2840 = vmatprep.subr.bf16.mxu0 %v2499_v10  ;;  %v1457_v54 = vpop.permute.xlu1 %1456 }
 0x2a0   :  { %v2355_v0 = vpop.f32.mrb[118].mxu0  ;;  %2841 = vmatpush3.bf16.msra.mxu0 %v4384_v59 }
 0x2a1   :  { %v2356_v9 = vadd.f32 %v2355_v0, %v2131_v24  ;;  %v2357_v55 = vpop.f32.mrb[119].mxu0  ;;  %v2465_v31 = vmax.f32 %v2353_v45, 0.0 }
 0x2a3   :  { %v2466_v25 = vmax.f32 %v2356_v9, 0.0  ;;  %v1462_v9 = vpop.permute.xlu0 %1461 }
 0x2a5   :  { %v2500_v28 = vpack.c.bf16 %v2466_v25, %v2465_v31 }
 0x2a6   :  { %v2360_v13 = vpop.f32.mrb[120].mxu0 }
 0x2a7   :  { %v2361_v52 = vadd.f32 %v2360_v13, %v2136_v34  ;;  %v2362_v18 = vpop.f32.mrb[121].mxu0  ;;  %2842 = vmatprep.subr.bf16.mxu0 %v2500_v28  ;;  %v1467_v34 = vpop.permute.xlu1 %1466 }
 0x2a8   :  { %v2363_v1 = vpop.f32.mrb[122].mxu0  ;;  %2843 = vmatpush3.bf16.msra.mxu0 %v4396_v8 }
 0x2a9   :  { %v2364_v47 = vadd.f32 %v2363_v1, %v2139_v17  ;;  %v2365_v59 = vpop.f32.mrb[123].mxu0  ;;  %v2467_v5 = vmax.f32 %v2361_v52, 0.0 }
 0x2ab   :  { %v2468_v22 = vmax.f32 %v2364_v47, 0.0  ;;  %v1472_v47 = vpop.permute.xlu0 %1471 }
 0x2ad   :  { %v2501_v2 = vpack.c.bf16 %v2468_v22, %v2467_v5 }
 0x2ae   :  { %v2368_v38 = vpop.f32.mrb[124].mxu0 }
 0x2af   :  { %v2369_v37 = vadd.f32 %v2368_v38, %v2144_v36  ;;  %v2370_v49 = vpop.f32.mrb[125].mxu0  ;;  %2844 = vmatprep.subr.bf16.mxu0 %v2501_v2  ;;  %v1477_v36 = vpop.permute.xlu1 %1476 }
 0x2b0   :  { %v2371_v58 = vpop.f32.mrb[126].mxu0  ;;  %2845 = vmatpush3.bf16.msra.mxu0 %v4404_v61  ;;  %v3273_v61 = vld [vmem:[%s4486_s5] ss:$12 sps:$4 sm:$0xff]   ;;  %v1482_v49 = vpop.permute.xlu0 %1481 }
 0x2b1   :  { %v2372_v8 = vadd.f32 %v2371_v58, %v2147_v4  ;;  %v2373_v43 = vpop.f32.mrb[127].mxu0  ;;  %v2469_v29 = vmax.f32 %v2369_v37, 0.0 }
 0x2b3   :  { %v2470_v46 = vmax.f32 %v2372_v8, 0.0 }
 0x2b5   :  { %v2502_v57 = vpack.c.bf16 %v2470_v46, %v2469_v29  ;;  %v1487_v29 = vpop.permute.xlu1 %1486 }
 0x2b6   :  { %v2376_v14 = vpop.f32.mrb[128].mxu0  ;;  %v2384_v48 = vpop.f32.mrb[68].mxu1 }
 0x2b7   :  { %v2377_v30 = vadd.f32 %v2376_v14, %v2152_v15  ;;  %v3049_v21 = vadd.f32 %v2384_v48, %v1442_v51  ;;  %v2378_v42 = vpop.f32.mrb[129].mxu0  ;;  %v2386_v16 = vpop.f32.mrb[69].mxu1  ;;  %2846 = vmatprep.subr.bf16.mxu0 %v2502_v57 }
 0x2b8   :  { %v2379_v63 = vpop.f32.mrb[130].mxu0  ;;  %v2387_v7 = vpop.f32.mrb[70].mxu1  ;;  %2847 = vmatpush3.bf16.msra.mxu0 %v4413_v41 }
 0x2b9   :  { %v2380_v53 = vadd.f32 %v2379_v63, %v2155_v12  ;;  %v3050_v44 = vadd.f32 %v2387_v7, %v1447_v40  ;;  %v2389_v3 = vpop.f32.mrb[71].mxu1  ;;  %2929 = vmatprep.subr.bf16.mxu0 %v3282_v20  ;;  %v2381_v32 = vpop.f32.mrb[131].mxu0  ;;  %v2471_v27 = vmax.f32 %v2377_v30, 0.0  ;;  %v2473_v62 = vmax.f32 %v3049_v21, 0.0 }
 0x2ba   :  { %v1492_v48 = vpop.permute.xlu0 %1491  ;;  %v1497_v42 = vpop.permute.xlu1 %1496 }
 0x2bb   :  { %v2472_v11 = vmax.f32 %v2380_v53, 0.0  ;;  %v2474_v26 = vmax.f32 %v3050_v44, 0.0  ;;  %2576 = vmatmul.mubr.bf16.vlgmr.msra.gmra.mrb[132].mxu0 %v3273_v61 }
 0x2bc   :  { %2945 = vmatprep.mubr.msk.bf16.mxu0 %vm3283_vm1, %v3282_v20 }
 0x2bd   :  { %v2503_v23 = vpack.c.bf16 %v2472_v11, %v2471_v27  ;;  %v2504_v56 = vpack.c.bf16 %v2474_v26, %v2473_v62 }
 0x2be   :  { %v2392_v39 = vpop.f32.mrb[72].mxu1  ;;  %v1502_v3 = vpop.permute.xlu0 %1501 }
 0x2bf   :  { %v3051_v41 = vadd.f32 %v2392_v39, %v1452_v50  ;;  %v2394_v33 = vpop.f32.mrb[73].mxu1  ;;  %2930 = vmatpush3.bf16.msra.mxu0 %v2503_v23  ;;  %v1507_v11 = vpop.permute.xlu1 %1506 }
 0x2c0   :  { %v2395_v10 = vpop.f32.mrb[74].mxu1  ;;  %2931 = vmatprep.subr.bf16.mxu0 %v3282_v20  ;;  %v3276_v33 = vld [vmem:[%s4486_s5 + $0x8] ss:$12 sps:$4 sm:$0xff]  }
 0x2c1   :  { %v3052_v35 = vadd.f32 %v2395_v10, %v1457_v54  ;;  %v2397_v24 = vpop.f32.mrb[75].mxu1  ;;  %v2475_v45 = vmax.f32 %v3051_v41, 0.0 }
 0x2c3   :  { %v2476_v19 = vmax.f32 %v3052_v35, 0.0  ;;  %2932 = vmatpush3.bf16.msra.mxu0 %v2504_v56 }
 0x2c4   :  { %2933 = vmatprep.subr.bf16.mxu0 %v3282_v20 }
 0x2c5   :  { %v2505_v0 = vpack.c.bf16 %v2476_v19, %v2475_v45 }
 0x2c6   :  { %v2400_v55 = vpop.f32.mrb[76].mxu1 }
 0x2c7   :  { %v3053_v31 = vadd.f32 %v2400_v55, %v1462_v9  ;;  %v2402_v25 = vpop.f32.mrb[77].mxu1  ;;  %2934 = vmatpush3.bf16.msra.mxu0 %v2505_v0  ;;  %v2520_v0 = vpop.permute.xlu0 %2519 }
 0x2c8   :  { %v2403_v28 = vpop.f32.mrb[78].mxu1  ;;  %2935 = vmatprep.subr.bf16.mxu0 %v3282_v20 }
 0x2c9   :  { %v3054_v13 = vadd.f32 %v2403_v28, %v1467_v34  ;;  %v2405_v17 = vpop.f32.mrb[79].mxu1  ;;  %v2477_v52 = vmax.f32 %v3053_v31, 0.0 }
 0x2cb   :  { %v2478_v18 = vmax.f32 %v3054_v13, 0.0 }
 0x2cd   :  { %v2506_v1 = vpack.c.bf16 %v2478_v18, %v2477_v52 }
 0x2ce   :  { %v2408_v59 = vpop.f32.mrb[80].mxu1 }
 0x2cf   :  { %v3055_v5 = vadd.f32 %v2408_v59, %v1472_v47  ;;  %v2410_v22 = vpop.f32.mrb[81].mxu1  ;;  %2936 = vmatpush3.bf16.msra.mxu0 %v2506_v1 }
 0x2d0   :  { %v2411_v2 = vpop.f32.mrb[82].mxu1  ;;  %2937 = vmatprep.subr.bf16.mxu0 %v3282_v20 }
 0x2d1   :  { %v3056_v6 = vadd.f32 %v2411_v2, %v1477_v36  ;;  %v2413_v38 = vpop.f32.mrb[83].mxu1  ;;  %v2479_v60 = vmax.f32 %v3055_v5, 0.0 }
 0x2d3   :  { %v2480_v4 = vmax.f32 %v3056_v6, 0.0 }
 0x2d5   :  { %v2507_v37 = vpack.c.bf16 %v2480_v4, %v2479_v60 }
 0x2d6   :  { %v2416_v58 = vpop.f32.mrb[84].mxu1 }
 0x2d7   :  { %v3057_v8 = vadd.f32 %v2416_v58, %v1482_v49  ;;  %v2418_v43 = vpop.f32.mrb[85].mxu1  ;;  %2938 = vmatpush3.bf16.msra.mxu0 %v2507_v37 }
 0x2d8   :  { %v2419_v46 = vpop.f32.mrb[86].mxu1  ;;  %2939 = vmatprep.subr.bf16.mxu0 %v3282_v20 }
 0x2d9   :  { %v3058_v40 = vadd.f32 %v2419_v46, %v1487_v29  ;;  %v2421_v51 = vpop.f32.mrb[87].mxu1  ;;  %v2481_v15 = vmax.f32 %v3057_v8, 0.0 }
 0x2db   :  { %v2482_v57 = vmax.f32 %v3058_v40, 0.0 }
 0x2dd   :  { %v2508_v14 = vpack.c.bf16 %v2482_v57, %v2481_v15 }
 0x2de   :  { %v2424_v12 = vpop.f32.mrb[88].mxu1 }
 0x2df   :  { %v3059_v30 = vadd.f32 %v2424_v12, %v1492_v48  ;;  %v2426_v21 = vpop.f32.mrb[89].mxu1  ;;  %2940 = vmatpush3.bf16.msra.mxu0 %v2508_v14 }
 0x2e0   :  { %v2427_v16 = vpop.f32.mrb[90].mxu1  ;;  %2941 = vmatprep.subr.bf16.mxu0 %v3282_v20 }
 0x2e1   :  { %v3060_v61 = vadd.f32 %v2427_v16, %v1497_v42  ;;  %v2429_v63 = vpop.f32.mrb[91].mxu1  ;;  %v2483_v7 = vmax.f32 %v3059_v30, 0.0 }
 0x2e3   :  { %v2484_v53 = vmax.f32 %v3060_v61, 0.0 }
 0x2e5   :  { %v2509_v44 = vpack.c.bf16 %v2484_v53, %v2483_v7 }
 0x2e6   :  { %v2432_v32 = vpop.f32.mrb[92].mxu1 }
 0x2e7   :  { %v3061_v27 = vadd.f32 %v2432_v32, %v1502_v3  ;;  %v2434_v62 = vpop.f32.mrb[93].mxu1  ;;  %2942 = vmatpush3.bf16.msra.mxu0 %v2509_v44 }
 0x2e8   :  { %v2435_v26 = vpop.f32.mrb[94].mxu1  ;;  %2943 = vmatprep.subr.bf16.mxu0 %v3282_v20  ;;  %v2525_v20 = vpop.permute.xlu1 %2524 }
 0x2e9   :  { %v3062_v23 = vadd.f32 %v2435_v26, %v1507_v11  ;;  %v2437_v56 = vpop.f32.mrb[95].mxu1  ;;  %v2485_v50 = vmax.f32 %v3061_v27, 0.0 }
 0x2eb   :  { %v2486_v39 = vmax.f32 %v3062_v23, 0.0 }
 0x2ed   :  { %v2510_v41 = vpack.c.bf16 %v2486_v39, %v2485_v50 }
 0x2ef   :  { %2944 = vmatpush3.bf16.msra.mxu0 %v2510_v41 }
 0x2f2   :  { %2946 = vmatmul.mubr.bf16.vlgmr.msra.gmra.mrb[136].mxu0 %v3276_v33 }
 0x38e   :  { %v2848_v54 = vpop.f32.mrb[132].mxu0 }
 0x38f   :  { %v2849_v10 = vpop.f32.mrb[133].mxu0 }
 0x390   :  { %v2850_v35 = vadd.f32 %v2849_v10, %v2848_v54  ;;  %v2851_v24 = vpop.f32.mrb[134].mxu0 }
 0x391   :  { %v2852_v45 = vpop.f32.mrb[135].mxu0 }
 0x392   :  { %v2853_v19 = vadd.f32 %v2852_v45, %v2851_v24  ;;  %v2578_v9 = vadd.f32 %v2850_v35, %v2520_v0 }
 0x394   :  { %v2581_v34 = vadd.f32 %v2853_v19, %v2525_v20 }
 0x3c5   :  { %v2618_v55 = vpop.f32.mrb[136].mxu0 }
 0x3c6   :  { %v2619_v31 = vadd.f32 %v2618_v55, %v2578_v9  ;;  %v2947_v25 = vpop.f32.mrb[137].mxu0 }
 0x3c7   :  { %v2621_v28 = vpop.f32.mrb[138].mxu0 }
 0x3c8   :  { %3277 = vtanh.f32 %v2619_v31  ;;  %v2622_v13 = vadd.f32 %v2621_v28, %v2581_v34  ;;  %v2948_v17 = vpop.f32.mrb[139].mxu0 }
 0x3ca   :  { %3279 = vtanh.f32 %v2622_v13 }
 0x3d2   :  { %v3278_v52 = vpop.eup %3277 }
 0x3d3   :  { %v2627_v18 = vmul.f32 2.0, %v3278_v52 }
 0x3d4   :  { %v3280_v1 = vpop.eup %3279 }
 0x3d5   :  { %2629 = vst [vmem:[%s4487_s7] sm:$0xff] %v2627_v18  ;;  %v2628_v47 = vmul.f32 2.0, %v3280_v1 }
 0x3d7   :  { %2630 = vst [vmem:[%s4487_s7 + $0x8] sm:$0xff] %v2628_v47 }

</bundles_post_ra>
